<compile_context>
chip_gen: v7x
topology: tpu7x:2x2x1
jax: 0.10.0
libtpu: 0.0.40
codegen_flags: <defaults>
</compile_context>

<pallas_src>
import functools
import math

import jax
import jax.numpy as jnp
from jax.experimental import pallas as pl
from jax.experimental.pallas import tpu as pltpu


# ----------------------------- kernel helpers ------------------------------

def _layernorm_f32(h, g, b, eps=1e-5):
    mu = jnp.mean(h, axis=-1, keepdims=True)
    var = jnp.mean(jnp.square(h - mu), axis=-1, keepdims=True)
    return (h - mu) * jax.lax.rsqrt(var + eps) * g + b


_GELU_C = math.sqrt(2.0 / math.pi)


def _gelu_f32(h):
    # tanh-approx GELU: routes the transcendental to the (otherwise idle) EUP
    # slot instead of a long erf VALU polynomial on the largest tensor.
    # TODO(synk): switch back to exact erf GELU if bit-fidelity to
    # torch.nn.GELU()'s default is required.
    return 0.5 * h * (1.0 + jnp.tanh(_GELU_C * (h + 0.044715 * (h * h * h))))


# --------------------------------- kernel ----------------------------------

def mhsa_kernel(x_ref,
                ln1_g, ln1_b,
                wqT, bqT, wkT, bkT, wvT, bvT,
                wo, bo,
                ln2_g, ln2_b,
                w1, b1, w2, b2,
                wout, bout,
                o_ref,
                *, num_heads, head_dim):
    bt, s, e = x_ref.shape
    r = bt * s
    nh, hd = num_heads, head_dim

    x = x_ref[...].reshape(r, e).astype(jnp.float32)

    # --- norm1 (f32 statistics) ---
    h = _layernorm_f32(x, ln1_g[...], ln1_b[...])
    # One transposed bf16 copy of the normed activations feeds all of q/k/v.
    hT = h.astype(jnp.bfloat16).T                                   # (E, r)

    def project_heads(wT, bT):
        # (E, E) @ (E, r): bf16 MXU operands, f32 accumulation, bias fused,
        # cast to bf16 immediately so the f32 slab dies right here.
        pT = (jnp.dot(wT[...], hT, preferred_element_type=jnp.float32)
              + bT[...]).astype(jnp.bfloat16)                       # (E, r)
        # (E, r) -> (nh, hd, r) -> (nh, r, hd) -> (nh*bt, s, hd).
        # Only minor-dim (last-two-axes) transposes + leading-dim reshapes:
        # no unaligned lane slices, no 4-D relayout.
        ph = jnp.swapaxes(pT.reshape(nh, hd, r), -1, -2)
        return ph.reshape(nh * bt, s, hd)

    qh = project_heads(wqT, bqT)     # 1/sqrt(head_dim) folded into wqT / bqT
    kh = project_heads(wkT, bkT)
    vh = project_heads(wvT, bvT)

    # --- attention: one batched matmul pair for all heads ---
    # TODO(synk): for long sequences, tile K/V with flash-style online softmax
    # instead of materialising the (nh*bt, S, S) score block (the crossover is
    # ~1.4x earlier on v7x's 64 MiB VMEM).
    sc = jnp.einsum('bqd,bkd->bqk', qh, kh,
                    preferred_element_type=jnp.float32)             # (nh*bt, s, s)
    sc = sc - jnp.max(sc, axis=-1, keepdims=True)
    prob = jnp.exp(sc)
    denom = jnp.sum(prob, axis=-1, keepdims=True)
    pv = jnp.einsum('bqk,bkd->bqd', prob.astype(jnp.bfloat16), vh,
                    preferred_element_type=jnp.float32)             # (nh*bt, s, hd)
    pv = pv * pl.reciprocal(denom, approx=True)                     # EUP, not VALU div

    # Back to row-major (r, E): exact inverse of the head transform above.
    attn = jnp.swapaxes(pv.astype(jnp.bfloat16).reshape(nh, r, hd), -1, -2)
    attn = attn.reshape(e, r).T                                     # (r, E) bf16

    # --- single K=E output projection (no per-head accumulation chain) ---
    o = jnp.dot(attn, wo[...], preferred_element_type=jnp.float32) + bo[...]

    # --- norm2 + MLP (E -> 4E -> E) ---
    o = _layernorm_f32(o, ln2_g[...], ln2_b[...])
    m = jnp.dot(o.astype(jnp.bfloat16), w1[...],
                preferred_element_type=jnp.float32) + b1[...]
    m = _gelu_f32(m)
    # TODO(synk): on v7x the w1/w2 matmuls could use fp8 weights (per-channel
    # scales folded into the bias path) for ~2x MXU throughput.
    m = jnp.dot(m.astype(jnp.bfloat16), w2[...],
                preferred_element_type=jnp.float32) + b2[...]

    # --- trailing GELU + output layer (E -> O_pad, lane-dense store) ---
    m = _gelu_f32(m)
    out = jnp.dot(m.astype(jnp.bfloat16), wout[...],
                  preferred_element_type=jnp.float32) + bout[...]

    o_ref[...] = out.reshape(bt, s, o_ref.shape[-1]).astype(o_ref.dtype)


# ------------------------------ sizing helpers ------------------------------

def _vmem_capacity_bytes():
    """Per-core VMEM capacity (generation-aware), conservative fallback."""
    try:
        cap = getattr(pltpu.get_tpu_info(), "vmem_capacity_bytes", None)
        if cap:
            return int(cap)
    except Exception:  # host-side query only; never causes a double-compile
        pass
    return 64 << 20    # v7x per-TensorCore size == smallest current generation


def _act_vmem_bytes(bt, s, e, nh, o_pad):
    """Rough upper bound on in-kernel activation VMEM for one grid step."""
    r = bt * s
    slabs = r * (4 * e) * 4 * 2            # MLP hidden (f32 accum + bf16 copy)
    slabs += r * e * 4 * 8                 # x/h/hT/q/k/v/attn/o working slabs
    slabs += r * o_pad * 4                 # padded output slab
    scores = bt * nh * s * s * 4 * 2       # scores + probabilities (f32)
    io = 2 * (bt * s * e + bt * s * o_pad) * 4   # double-buffered x / out blocks
    return slabs + scores + io


def _choose_block_batch(b, s, e, nh, o_pad, weight_bytes, vmem_budget,
                        target_rows=256):
    """Batch elements per grid step.

    Prefers >= 2 grid steps (v7x megacore sharding + DMA/compute overlap),
    then the smallest bt whose slab reaches ~target_rows MXU rows (256-row MXU
    on v6e/v7x), all under the per-generation VMEM budget.
    """
    divisors = [d for d in range(1, b + 1) if b % d == 0]
    fits = [d for d in divisors
            if weight_bytes + _act_vmem_bytes(d, s, e, nh, o_pad) <= vmem_budget]
    if not fits:
        fits = [1]
    multi = [d for d in fits if b // d >= 2] or fits
    good = [d for d in multi if d * s >= target_rows]
    return min(good) if good else max(multi)


# ------------------------- one-time weight preparation -----------------------

def prepare_mhsa_params(params, *, num_heads):
    """One-time weight preprocessing, hoisted out of the per-call path.

    Casts weights to bf16, pre-transposes the q/k/v projections (so the kernel
    produces head-major activations with only minor-dim transposes), folds
    1/sqrt(head_dim) into wq/bq, and lane-pads the output layer to a multiple
    of 128 for unmasked stores.
    """
    E = params["wq"].shape[0]
    assert E % num_heads == 0, "embed_dim must be divisible by num_heads"
    head_dim = E // num_heads
    inv_scale = 1.0 / math.sqrt(head_dim)
    O = params["wout"].shape[1]
    O_pad = ((O + 127) // 128) * 128

    f32, bf16 = jnp.float32, jnp.bfloat16
    wout_p = jnp.zeros((E, O_pad), f32).at[:, :O].set(params["wout"].astype(f32))
    bout_p = jnp.zeros((1, O_pad), f32).at[:, :O].set(params["bout"].astype(f32))

    ordered = (
        params["ln1_g"].astype(f32), params["ln1_b"].astype(f32),
        (params["wq"] * inv_scale).T.astype(bf16),
        (params["bq"] * inv_scale).reshape(E, 1).astype(f32),
        params["wk"].T.astype(bf16), params["bk"].reshape(E, 1).astype(f32),
        params["wv"].T.astype(bf16), params["bv"].reshape(E, 1).astype(f32),
        params["wo"].astype(bf16), params["bo"].astype(f32),
        params["ln2_g"].astype(f32), params["ln2_b"].astype(f32),
        params["w1"].astype(bf16), params["b1"].astype(f32),
        params["w2"].astype(bf16), params["b2"].astype(f32),
        wout_p.astype(bf16), bout_p,
    )
    ordered = tuple(jax.block_until_ready(jnp.asarray(a)) for a in ordered)
    meta = dict(num_heads=num_heads, head_dim=head_dim, embed_dim=E,
                output_dim=O, output_dim_padded=O_pad)
    return {"ordered": ordered, "meta": meta}


# --------------------------------- wrapper ----------------------------------

def mhsa_forward(x, prepared):
    ordered = prepared["ordered"]
    meta = prepared["meta"]
    B, S, E = x.shape
    assert E == meta["embed_dim"]
    nh, hd = meta["num_heads"], meta["head_dim"]
    O, O_pad = meta["output_dim"], meta["output_dim_padded"]

    weight_bytes = sum(int(a.size) * a.dtype.itemsize for a in ordered)
    # Generation-aware budget: ~3/4 of per-core VMEM (each TensorCore holds its
    # own copy of the weights under megacore parallelism).
    vmem_budget = int(_vmem_capacity_bytes() * 3 // 4)

    bt = _choose_block_batch(B, S, E, nh, O_pad, weight_bytes, vmem_budget)
    grid = (B // bt,)

    vmem_need = weight_bytes + _act_vmem_bytes(bt, S, E, nh, O_pad)
    # Always set explicitly (v5e's default scoped limit is only 16 MiB), capped
    # below the physical per-core VMEM of the current generation.
    vmem_limit = int(min(vmem_budget, max(2 * vmem_need + (8 << 20), 32 << 20)))

    flops = (3 * 2 * B * S * E * E            # q/k/v projections
             + 4 * B * S * S * E              # QK^T + PV
             + 2 * B * S * E * E              # output projection
             + 2 * 2 * B * S * E * 4 * E      # MLP
             + 2 * B * S * E * O_pad)         # output layer
    transcendentals = B * nh * S * S + 5 * B * S * E + 2 * B * S
    bytes_accessed = int(x.size * x.dtype.itemsize
                         + B * S * O_pad * x.dtype.itemsize
                         + weight_bytes)
    cost = pl.CostEstimate(flops=int(flops),
                           transcendentals=int(transcendentals),
                           bytes_accessed=bytes_accessed)

    kernel = functools.partial(mhsa_kernel, num_heads=nh, head_dim=hd)
    # Whole-array VMEM operands: loaded once, not pipelined, not double-buffered.
    weight_spec = pl.BlockSpec(memory_space=pltpu.MemorySpace.VMEM)

    out_p = pl.pallas_call(
        kernel,
        out_shape=jax.ShapeDtypeStruct((B, S, O_pad), x.dtype),
        grid_spec=pltpu.PrefetchScalarGridSpec(
            num_scalar_prefetch=0,
            grid=grid,
            in_specs=[pl.BlockSpec((bt, S, E), lambda b: (b, 0, 0))]
                     + [weight_spec] * len(ordered),
            out_specs=pl.BlockSpec((bt, S, O_pad), lambda b: (b, 0, 0)),
        ),
        compiler_params=pltpu.CompilerParams(
            dimension_semantics=("parallel",),
            vmem_limit_bytes=vmem_limit),
        cost_estimate=cost,
    )(x, *ordered)

    return out_p[..., :O]


# ------------------------------ pure-JAX reference ---------------------------

def mhsa_reference(x, params, *, num_heads):
    """Pure-JAX f32 reference mirroring the PyTorch forward exactly."""
    B, S, E = x.shape
    D = E // num_heads
    scale = math.sqrt(D)

    def ln(h, g, b):
        mu = jnp.mean(h, axis=-1, keepdims=True)
        var = jnp.mean((h - mu) ** 2, axis=-1, keepdims=True)
        return (h - mu) / jnp.sqrt(var + 1e-5) * g + b

    def gelu(h):  # exact erf GELU, matching torch.nn.GELU() default
        return 0.5 * h * (1.0 + jax.lax.erf(h / jnp.sqrt(2.0)))

    h = ln(x, params["ln1_g"], params["ln1_b"])
    q = h @ params["wq"] + params["bq"]
    k = h @ params["wk"] + params["bk"]
    v = h @ params["wv"] + params["bv"]
    q = q.reshape(B, S, num_heads, D).transpose(0, 2, 1, 3)
    k = k.reshape(B, S, num_heads, D).transpose(0, 2, 1, 3)
    v = v.reshape(B, S, num_heads, D).transpose(0, 2, 1, 3)
    w = jnp.einsum("bhqd,bhkd->bhqk", q, k) / scale
    w = jax.nn.softmax(w, axis=-1)
    ao = jnp.einsum("bhqk,bhkd->bhqd", w, v)
    ao = ao.transpose(0, 2, 1, 3).reshape(B, S, E)
    o = ao @ params["wo"] + params["bo"]
    o = ln(o, params["ln2_g"], params["ln2_b"])
    m = gelu(o @ params["w1"] + params["b1"]) @ params["w2"] + params["b2"]
    m = gelu(m)
    return m @ params["wout"] + params["bout"]


def init_params(key, embed_dim, output_dim, mlp_scale=4):
    E, O, H = embed_dim, output_dim, embed_dim * mlp_scale
    keys = jax.random.split(key, 16)

    def w(k, shape, s=0.05):
        return jax.random.normal(k, shape, jnp.float32) * s

    return {
        "ln1_g": 1.0 + w(keys[0], (1, E)),
        "ln1_b": w(keys[1], (1, E)),
        "wq": w(keys[2], (E, E)), "bq": w(keys[3], (1, E)),
        "wk": w(keys[4], (E, E)), "bk": w(keys[5], (1, E)),
        "wv": w(keys[6], (E, E)), "bv": w(keys[7], (1, E)),
        "wo": w(keys[8], (E, E)), "bo": w(keys[9], (1, E)),
        "ln2_g": 1.0 + w(keys[10], (1, E)),
        "ln2_b": w(keys[11], (1, E)),
        "w1": w(keys[12], (E, H)), "b1": w(keys[13], (1, H)),
        "w2": w(keys[14], (H, E)), "b2": w(keys[15], (1, E)),
        "wout": w(jax.random.fold_in(key, 100), (E, O)),
        "bout": w(jax.random.fold_in(key, 101), (1, O)),
    }


if __name__ == "__main__":
    # small, shape-consistent config: embed_dim=32, 8 heads (head_dim=4),
    # output_dim=16, batch=2, seq=8
    B, S, E, O, NH = 2, 8, 32, 16, 8

    key = jax.random.PRNGKey(0)
    kx, kp = jax.random.split(key)
    x = jax.random.normal(kx, (B, S, E), jnp.float32)
    params = init_params(kp, E, O)

    prepared = prepare_mhsa_params(params, num_heads=NH)  # one-time weight prep
    out = mhsa_forward(x, prepared)
    out = jax.block_until_ready(out)

    ref = mhsa_reference(x, params, num_heads=NH)
    assert out.shape == (B, S, O), out.shape
    err = float(jnp.max(jnp.abs(out - ref)))
    # bf16 MXU operands (f32 accumulation) + tanh-approx GELU + approx softmax
    # reciprocal vs an exact f32 reference -> relaxed tolerance.
    assert err < 3e-2, err
    print("KERNEL_OK")
</pallas_src>

<mosaic_0001>
module attributes {stable_mosaic.version = 11 : i64} {
  func.func @mhsa_kernel(%arg0: i32, %arg1: memref<1x8x32xf32, #tpu.memory_space<vmem>>, %arg2: memref<1x32xf32, #tpu.memory_space<vmem>>, %arg3: memref<1x32xf32, #tpu.memory_space<vmem>>, %arg4: memref<32x32xbf16, #tpu.memory_space<vmem>>, %arg5: memref<32x1xf32, #tpu.memory_space<vmem>>, %arg6: memref<32x32xbf16, #tpu.memory_space<vmem>>, %arg7: memref<32x1xf32, #tpu.memory_space<vmem>>, %arg8: memref<32x32xbf16, #tpu.memory_space<vmem>>, %arg9: memref<32x1xf32, #tpu.memory_space<vmem>>, %arg10: memref<32x32xbf16, #tpu.memory_space<vmem>>, %arg11: memref<1x32xf32, #tpu.memory_space<vmem>>, %arg12: memref<1x32xf32, #tpu.memory_space<vmem>>, %arg13: memref<1x32xf32, #tpu.memory_space<vmem>>, %arg14: memref<32x128xbf16, #tpu.memory_space<vmem>>, %arg15: memref<1x128xf32, #tpu.memory_space<vmem>>, %arg16: memref<128x32xbf16, #tpu.memory_space<vmem>>, %arg17: memref<1x32xf32, #tpu.memory_space<vmem>>, %arg18: memref<32x128xbf16, #tpu.memory_space<vmem>>, %arg19: memref<1x128xf32, #tpu.memory_space<vmem>>, %arg20: memref<1x8x128xf32, #tpu.memory_space<vmem>>) attributes {dimension_semantics = [#tpu.dimension_semantics<parallel>], iteration_bounds = array<i64: 2>, scalar_prefetch = 0 : i64, scratch_operands = 0 : i64, tpu.core_type = #tpu.core_type<tc>, window_params = [{transform_indices = @transform_0, window_bounds = array<i64: 1, 8, 32>}, {pipeline_mode = #tpu.pipeline_mode<synchronous>, transform_indices = @transform_1, window_bounds = array<i64: 1, 32>}, {pipeline_mode = #tpu.pipeline_mode<synchronous>, transform_indices = @transform_2, window_bounds = array<i64: 1, 32>}, {pipeline_mode = #tpu.pipeline_mode<synchronous>, transform_indices = @transform_3, window_bounds = array<i64: 32, 32>}, {pipeline_mode = #tpu.pipeline_mode<synchronous>, transform_indices = @transform_4, window_bounds = array<i64: 32, 1>}, {pipeline_mode = #tpu.pipeline_mode<synchronous>, transform_indices = @transform_5, window_bounds = array<i64: 32, 32>}, {pipeline_mode = #tpu.pipeline_mode<synchronous>, transform_indices = @transform_6, window_bounds = array<i64: 32, 1>}, {pipeline_mode = #tpu.pipeline_mode<synchronous>, transform_indices = @transform_7, window_bounds = array<i64: 32, 32>}, {pipeline_mode = #tpu.pipeline_mode<synchronous>, transform_indices = @transform_8, window_bounds = array<i64: 32, 1>}, {pipeline_mode = #tpu.pipeline_mode<synchronous>, transform_indices = @transform_9, window_bounds = array<i64: 32, 32>}, {pipeline_mode = #tpu.pipeline_mode<synchronous>, transform_indices = @transform_10, window_bounds = array<i64: 1, 32>}, {pipeline_mode = #tpu.pipeline_mode<synchronous>, transform_indices = @transform_11, window_bounds = array<i64: 1, 32>}, {pipeline_mode = #tpu.pipeline_mode<synchronous>, transform_indices = @transform_12, window_bounds = array<i64: 1, 32>}, {pipeline_mode = #tpu.pipeline_mode<synchronous>, transform_indices = @transform_13, window_bounds = array<i64: 32, 128>}, {pipeline_mode = #tpu.pipeline_mode<synchronous>, transform_indices = @transform_14, window_bounds = array<i64: 1, 128>}, {pipeline_mode = #tpu.pipeline_mode<synchronous>, transform_indices = @transform_15, window_bounds = array<i64: 128, 32>}, {pipeline_mode = #tpu.pipeline_mode<synchronous>, transform_indices = @transform_16, window_bounds = array<i64: 1, 32>}, {pipeline_mode = #tpu.pipeline_mode<synchronous>, transform_indices = @transform_17, window_bounds = array<i64: 32, 128>}, {pipeline_mode = #tpu.pipeline_mode<synchronous>, transform_indices = @transform_18, window_bounds = array<i64: 1, 128>}, {transform_indices = @transform_19, window_bounds = array<i64: 1, 8, 128>}]} {
    %c0 = arith.constant 0 : index
    %c0_0 = arith.constant 0 : index
    %c0_1 = arith.constant 0 : index
    %0 = vector.load %arg1[%c0, %c0_0, %c0_1] : memref<1x8x32xf32, #tpu.memory_space<vmem>>, vector<1x8x32xf32>
    %1 = vector.shape_cast %0 : vector<1x8x32xf32> to vector<8x32xf32>
    %c0_2 = arith.constant 0 : index
    %c0_3 = arith.constant 0 : index
    %2 = vector.load %arg2[%c0_2, %c0_3] : memref<1x32xf32, #tpu.memory_space<vmem>>, vector<1x32xf32>
    %c0_4 = arith.constant 0 : index
    %c0_5 = arith.constant 0 : index
    %3 = vector.load %arg3[%c0_4, %c0_5] : memref<1x32xf32, #tpu.memory_space<vmem>>, vector<1x32xf32>
    %cst = arith.constant dense<0.000000e+00> : vector<8xf32>
    %4 = vector.multi_reduction <add>, %1, %cst [1] : vector<8x32xf32> to vector<8xf32>
    %5 = vector.shape_cast %4 : vector<8xf32> to vector<8x1xf32>
    %cst_6 = arith.constant 3.200000e+01 : f32
    %6 = vector.broadcast %cst_6 : f32 to vector<8x1xf32>
    %7 = arith.divf %5, %6 : vector<8x1xf32>
    %8 = vector.broadcast %7 : vector<8x1xf32> to vector<8x32xf32>
    %9 = arith.subf %1, %8 : vector<8x32xf32>
    %10 = arith.mulf %9, %9 : vector<8x32xf32>
    %cst_7 = arith.constant dense<0.000000e+00> : vector<8xf32>
    %11 = vector.multi_reduction <add>, %10, %cst_7 [1] : vector<8x32xf32> to vector<8xf32>
    %12 = vector.shape_cast %11 : vector<8xf32> to vector<8x1xf32>
    %cst_8 = arith.constant 3.200000e+01 : f32
    %13 = vector.broadcast %cst_8 : f32 to vector<8x1xf32>
    %14 = arith.divf %12, %13 : vector<8x1xf32>
    %15 = vector.broadcast %7 : vector<8x1xf32> to vector<8x32xf32>
    %16 = arith.subf %1, %15 : vector<8x32xf32>
    %cst_9 = arith.constant 9.99999974E-6 : f32
    %17 = vector.broadcast %cst_9 : f32 to vector<8x1xf32>
    %18 = arith.addf %14, %17 : vector<8x1xf32>
    %19 = math.rsqrt %18 : vector<8x1xf32>
    %20 = vector.broadcast %19 : vector<8x1xf32> to vector<8x32xf32>
    %21 = arith.mulf %16, %20 : vector<8x32xf32>
    %22 = vector.broadcast %2 : vector<1x32xf32> to vector<8x32xf32>
    %23 = arith.mulf %21, %22 : vector<8x32xf32>
    %24 = vector.broadcast %3 : vector<1x32xf32> to vector<8x32xf32>
    %25 = arith.addf %23, %24 : vector<8x32xf32>
    %26 = arith.truncf %25 : vector<8x32xf32> to vector<8x32xbf16>
    %27 = tpu.transpose %26, [1, 0] : vector<8x32xbf16> -> vector<32x8xbf16>
    %c0_10 = arith.constant 0 : index
    %c0_11 = arith.constant 0 : index
    %28 = vector.load %arg4[%c0_10, %c0_11] : memref<32x32xbf16, #tpu.memory_space<vmem>>, vector<32x32xbf16>
    %cst_12 = arith.constant dense<0.000000e+00> : vector<32x8xf32>
    %29 = tpu.matmul %28, %27, %cst_12 {dimension_numbers = #tpu.dot_dimension_numbers<[1], [0], [0], [1], [0, 0, 1, 1], [], []>} : vector<32x32xbf16>, vector<32x8xbf16>, vector<32x8xf32> -> vector<32x8xf32>
    %c0_13 = arith.constant 0 : index
    %c0_14 = arith.constant 0 : index
    %30 = vector.load %arg5[%c0_13, %c0_14] : memref<32x1xf32, #tpu.memory_space<vmem>>, vector<32x1xf32>
    %31 = vector.broadcast %30 : vector<32x1xf32> to vector<32x8xf32>
    %32 = arith.addf %29, %31 : vector<32x8xf32>
    %33 = arith.truncf %32 : vector<32x8xf32> to vector<32x8xbf16>
    %34 = vector.shape_cast %33 : vector<32x8xbf16> to vector<8x4x8xbf16>
    %35 = tpu.transpose %34, [0, 2, 1] : vector<8x4x8xbf16> -> vector<8x8x4xbf16>
    %c0_15 = arith.constant 0 : index
    %c0_16 = arith.constant 0 : index
    %36 = vector.load %arg6[%c0_15, %c0_16] : memref<32x32xbf16, #tpu.memory_space<vmem>>, vector<32x32xbf16>
    %cst_17 = arith.constant dense<0.000000e+00> : vector<32x8xf32>
    %37 = tpu.matmul %36, %27, %cst_17 {dimension_numbers = #tpu.dot_dimension_numbers<[1], [0], [0], [1], [0, 0, 1, 1], [], []>} : vector<32x32xbf16>, vector<32x8xbf16>, vector<32x8xf32> -> vector<32x8xf32>
    %c0_18 = arith.constant 0 : index
    %c0_19 = arith.constant 0 : index
    %38 = vector.load %arg7[%c0_18, %c0_19] : memref<32x1xf32, #tpu.memory_space<vmem>>, vector<32x1xf32>
    %39 = vector.broadcast %38 : vector<32x1xf32> to vector<32x8xf32>
    %40 = arith.addf %37, %39 : vector<32x8xf32>
    %41 = arith.truncf %40 : vector<32x8xf32> to vector<32x8xbf16>
    %42 = vector.shape_cast %41 : vector<32x8xbf16> to vector<8x4x8xbf16>
    %43 = tpu.transpose %42, [0, 2, 1] : vector<8x4x8xbf16> -> vector<8x8x4xbf16>
    %c0_20 = arith.constant 0 : index
    %c0_21 = arith.constant 0 : index
    %44 = vector.load %arg8[%c0_20, %c0_21] : memref<32x32xbf16, #tpu.memory_space<vmem>>, vector<32x32xbf16>
    %cst_22 = arith.constant dense<0.000000e+00> : vector<32x8xf32>
    %45 = tpu.matmul %44, %27, %cst_22 {dimension_numbers = #tpu.dot_dimension_numbers<[1], [0], [0], [1], [0, 0, 1, 1], [], []>} : vector<32x32xbf16>, vector<32x8xbf16>, vector<32x8xf32> -> vector<32x8xf32>
    %c0_23 = arith.constant 0 : index
    %c0_24 = arith.constant 0 : index
    %46 = vector.load %arg9[%c0_23, %c0_24] : memref<32x1xf32, #tpu.memory_space<vmem>>, vector<32x1xf32>
    %47 = vector.broadcast %46 : vector<32x1xf32> to vector<32x8xf32>
    %48 = arith.addf %45, %47 : vector<32x8xf32>
    %49 = arith.truncf %48 : vector<32x8xf32> to vector<32x8xbf16>
    %50 = vector.shape_cast %49 : vector<32x8xbf16> to vector<8x4x8xbf16>
    %51 = tpu.transpose %50, [0, 2, 1] : vector<8x4x8xbf16> -> vector<8x8x4xbf16>
    "tpu.trace_start"() <{level = 10 : i32, message = "bqd,bkd->bqk"}> : () -> ()
    %cst_25 = arith.constant dense<0.000000e+00> : vector<8x8x8xf32>
    %52 = tpu.matmul %35, %43, %cst_25 {dimension_numbers = #tpu.dot_dimension_numbers<[2], [2], [1], [1], [0, 0, 0, 1, 1, 1], [0], [0]>} : vector<8x8x4xbf16>, vector<8x8x4xbf16>, vector<8x8x8xf32> -> vector<8x8x8xf32>
    "tpu.trace_stop"() : () -> ()
    %cst_26 = arith.constant dense<0xFF800000> : vector<8x8xf32>
    %53 = vector.multi_reduction <maximumf>, %52, %cst_26 [2] : vector<8x8x8xf32> to vector<8x8xf32>
    %54 = vector.shape_cast %53 : vector<8x8xf32> to vector<8x8x1xf32>
    %55 = vector.broadcast %54 : vector<8x8x1xf32> to vector<8x8x8xf32>
    %56 = arith.subf %52, %55 : vector<8x8x8xf32>
    %57 = math.exp %56 : vector<8x8x8xf32>
    %cst_27 = arith.constant dense<0.000000e+00> : vector<8x8xf32>
    %58 = vector.multi_reduction <add>, %57, %cst_27 [2] : vector<8x8x8xf32> to vector<8x8xf32>
    %59 = vector.shape_cast %58 : vector<8x8xf32> to vector<8x8x1xf32>
    %60 = arith.truncf %57 : vector<8x8x8xf32> to vector<8x8x8xbf16>
    "tpu.trace_start"() <{level = 10 : i32, message = "bqk,bkd->bqd"}> : () -> ()
    %cst_28 = arith.constant dense<0.000000e+00> : vector<8x8x4xf32>
    %61 = tpu.matmul %60, %51, %cst_28 {dimension_numbers = #tpu.dot_dimension_numbers<[2], [1], [1], [2], [0, 0, 0, 1, 1, 2], [0], [0]>} : vector<8x8x8xbf16>, vector<8x8x4xbf16>, vector<8x8x4xf32> -> vector<8x8x4xf32>
    "tpu.trace_stop"() : () -> ()
    %62 = tpu.reciprocal %59 {approx = true} : vector<8x8x1xf32> -> vector<8x8x1xf32>
    %63 = vector.broadcast %62 : vector<8x8x1xf32> to vector<8x8x4xf32>
    %64 = arith.mulf %61, %63 : vector<8x8x4xf32>
    %65 = arith.truncf %64 : vector<8x8x4xf32> to vector<8x8x4xbf16>
    %66 = tpu.transpose %65, [0, 2, 1] : vector<8x8x4xbf16> -> vector<8x4x8xbf16>
    %67 = vector.shape_cast %66 : vector<8x4x8xbf16> to vector<32x8xbf16>
    %68 = tpu.transpose %67, [1, 0] : vector<32x8xbf16> -> vector<8x32xbf16>
    %c0_29 = arith.constant 0 : index
    %c0_30 = arith.constant 0 : index
    %69 = vector.load %arg10[%c0_29, %c0_30] : memref<32x32xbf16, #tpu.memory_space<vmem>>, vector<32x32xbf16>
    %cst_31 = arith.constant dense<0.000000e+00> : vector<8x32xf32>
    %70 = tpu.matmul %68, %69, %cst_31 {dimension_numbers = #tpu.dot_dimension_numbers<[1], [0], [0], [1], [0, 0, 1, 1], [], []>} : vector<8x32xbf16>, vector<32x32xbf16>, vector<8x32xf32> -> vector<8x32xf32>
    %c0_32 = arith.constant 0 : index
    %c0_33 = arith.constant 0 : index
    %71 = vector.load %arg11[%c0_32, %c0_33] : memref<1x32xf32, #tpu.memory_space<vmem>>, vector<1x32xf32>
    %72 = vector.broadcast %71 : vector<1x32xf32> to vector<8x32xf32>
    %73 = arith.addf %70, %72 : vector<8x32xf32>
    %c0_34 = arith.constant 0 : index
    %c0_35 = arith.constant 0 : index
    %74 = vector.load %arg12[%c0_34, %c0_35] : memref<1x32xf32, #tpu.memory_space<vmem>>, vector<1x32xf32>
    %c0_36 = arith.constant 0 : index
    %c0_37 = arith.constant 0 : index
    %75 = vector.load %arg13[%c0_36, %c0_37] : memref<1x32xf32, #tpu.memory_space<vmem>>, vector<1x32xf32>
    %cst_38 = arith.constant dense<0.000000e+00> : vector<8xf32>
    %76 = vector.multi_reduction <add>, %73, %cst_38 [1] : vector<8x32xf32> to vector<8xf32>
    %77 = vector.shape_cast %76 : vector<8xf32> to vector<8x1xf32>
    %cst_39 = arith.constant 3.200000e+01 : f32
    %78 = vector.broadcast %cst_39 : f32 to vector<8x1xf32>
    %79 = arith.divf %77, %78 : vector<8x1xf32>
    %80 = vector.broadcast %79 : vector<8x1xf32> to vector<8x32xf32>
    %81 = arith.subf %73, %80 : vector<8x32xf32>
    %82 = arith.mulf %81, %81 : vector<8x32xf32>
    %cst_40 = arith.constant dense<0.000000e+00> : vector<8xf32>
    %83 = vector.multi_reduction <add>, %82, %cst_40 [1] : vector<8x32xf32> to vector<8xf32>
    %84 = vector.shape_cast %83 : vector<8xf32> to vector<8x1xf32>
    %cst_41 = arith.constant 3.200000e+01 : f32
    %85 = vector.broadcast %cst_41 : f32 to vector<8x1xf32>
    %86 = arith.divf %84, %85 : vector<8x1xf32>
    %87 = vector.broadcast %79 : vector<8x1xf32> to vector<8x32xf32>
    %88 = arith.subf %73, %87 : vector<8x32xf32>
    %cst_42 = arith.constant 9.99999974E-6 : f32
    %89 = vector.broadcast %cst_42 : f32 to vector<8x1xf32>
    %90 = arith.addf %86, %89 : vector<8x1xf32>
    %91 = math.rsqrt %90 : vector<8x1xf32>
    %92 = vector.broadcast %91 : vector<8x1xf32> to vector<8x32xf32>
    %93 = arith.mulf %88, %92 : vector<8x32xf32>
    %94 = vector.broadcast %74 : vector<1x32xf32> to vector<8x32xf32>
    %95 = arith.mulf %93, %94 : vector<8x32xf32>
    %96 = vector.broadcast %75 : vector<1x32xf32> to vector<8x32xf32>
    %97 = arith.addf %95, %96 : vector<8x32xf32>
    %98 = arith.truncf %97 : vector<8x32xf32> to vector<8x32xbf16>
    %c0_43 = arith.constant 0 : index
    %c0_44 = arith.constant 0 : index
    %99 = vector.load %arg14[%c0_43, %c0_44] : memref<32x128xbf16, #tpu.memory_space<vmem>>, vector<32x128xbf16>
    %cst_45 = arith.constant dense<0.000000e+00> : vector<8x128xf32>
    %100 = tpu.matmul %98, %99, %cst_45 {dimension_numbers = #tpu.dot_dimension_numbers<[1], [0], [0], [1], [0, 0, 1, 1], [], []>} : vector<8x32xbf16>, vector<32x128xbf16>, vector<8x128xf32> -> vector<8x128xf32>
    %c0_46 = arith.constant 0 : index
    %c0_47 = arith.constant 0 : index
    %101 = vector.load %arg15[%c0_46, %c0_47] : memref<1x128xf32, #tpu.memory_space<vmem>>, vector<1x128xf32>
    %102 = vector.broadcast %101 : vector<1x128xf32> to vector<8x128xf32>
    %103 = arith.addf %100, %102 : vector<8x128xf32>
    %cst_48 = arith.constant 5.000000e-01 : f32
    %104 = vector.broadcast %cst_48 : f32 to vector<8x128xf32>
    %105 = arith.mulf %104, %103 : vector<8x128xf32>
    %106 = arith.mulf %103, %103 : vector<8x128xf32>
    %107 = arith.mulf %106, %103 : vector<8x128xf32>
    %cst_49 = arith.constant 4.471500e-02 : f32
    %108 = vector.broadcast %cst_49 : f32 to vector<8x128xf32>
    %109 = arith.mulf %108, %107 : vector<8x128xf32>
    %110 = arith.addf %103, %109 : vector<8x128xf32>
    %cst_50 = arith.constant 0.797884583 : f32
    %111 = vector.broadcast %cst_50 : f32 to vector<8x128xf32>
    %112 = arith.mulf %111, %110 : vector<8x128xf32>
    %113 = math.tanh %112 : vector<8x128xf32>
    %cst_51 = arith.constant 1.000000e+00 : f32
    %114 = vector.broadcast %cst_51 : f32 to vector<8x128xf32>
    %115 = arith.addf %114, %113 : vector<8x128xf32>
    %116 = arith.mulf %105, %115 : vector<8x128xf32>
    %117 = arith.truncf %116 : vector<8x128xf32> to vector<8x128xbf16>
    %c0_52 = arith.constant 0 : index
    %c0_53 = arith.constant 0 : index
    %118 = vector.load %arg16[%c0_52, %c0_53] : memref<128x32xbf16, #tpu.memory_space<vmem>>, vector<128x32xbf16>
    %cst_54 = arith.constant dense<0.000000e+00> : vector<8x32xf32>
    %119 = tpu.matmul %117, %118, %cst_54 {dimension_numbers = #tpu.dot_dimension_numbers<[1], [0], [0], [1], [0, 0, 1, 1], [], []>} : vector<8x128xbf16>, vector<128x32xbf16>, vector<8x32xf32> -> vector<8x32xf32>
    %c0_55 = arith.constant 0 : index
    %c0_56 = arith.constant 0 : index
    %120 = vector.load %arg17[%c0_55, %c0_56] : memref<1x32xf32, #tpu.memory_space<vmem>>, vector<1x32xf32>
    %121 = vector.broadcast %120 : vector<1x32xf32> to vector<8x32xf32>
    %122 = arith.addf %119, %121 : vector<8x32xf32>
    %cst_57 = arith.constant 5.000000e-01 : f32
    %123 = vector.broadcast %cst_57 : f32 to vector<8x32xf32>
    %124 = arith.mulf %123, %122 : vector<8x32xf32>
    %125 = arith.mulf %122, %122 : vector<8x32xf32>
    %126 = arith.mulf %125, %122 : vector<8x32xf32>
    %cst_58 = arith.constant 4.471500e-02 : f32
    %127 = vector.broadcast %cst_58 : f32 to vector<8x32xf32>
    %128 = arith.mulf %127, %126 : vector<8x32xf32>
    %129 = arith.addf %122, %128 : vector<8x32xf32>
    %cst_59 = arith.constant 0.797884583 : f32
    %130 = vector.broadcast %cst_59 : f32 to vector<8x32xf32>
    %131 = arith.mulf %130, %129 : vector<8x32xf32>
    %132 = math.tanh %131 : vector<8x32xf32>
    %cst_60 = arith.constant 1.000000e+00 : f32
    %133 = vector.broadcast %cst_60 : f32 to vector<8x32xf32>
    %134 = arith.addf %133, %132 : vector<8x32xf32>
    %135 = arith.mulf %124, %134 : vector<8x32xf32>
    %136 = arith.truncf %135 : vector<8x32xf32> to vector<8x32xbf16>
    %c0_61 = arith.constant 0 : index
    %c0_62 = arith.constant 0 : index
    %137 = vector.load %arg18[%c0_61, %c0_62] : memref<32x128xbf16, #tpu.memory_space<vmem>>, vector<32x128xbf16>
    %cst_63 = arith.constant dense<0.000000e+00> : vector<8x128xf32>
    %138 = tpu.matmul %136, %137, %cst_63 {dimension_numbers = #tpu.dot_dimension_numbers<[1], [0], [0], [1], [0, 0, 1, 1], [], []>} : vector<8x32xbf16>, vector<32x128xbf16>, vector<8x128xf32> -> vector<8x128xf32>
    %c0_64 = arith.constant 0 : index
    %c0_65 = arith.constant 0 : index
    %139 = vector.load %arg19[%c0_64, %c0_65] : memref<1x128xf32, #tpu.memory_space<vmem>>, vector<1x128xf32>
    %140 = vector.broadcast %139 : vector<1x128xf32> to vector<8x128xf32>
    %141 = arith.addf %138, %140 : vector<8x128xf32>
    %142 = vector.shape_cast %141 : vector<8x128xf32> to vector<1x8x128xf32>
    %c0_66 = arith.constant 0 : index
    %c0_67 = arith.constant 0 : index
    %c0_68 = arith.constant 0 : index
    %143 = vector.load %arg20[%c0_66, %c0_67, %c0_68] : memref<1x8x128xf32, #tpu.memory_space<vmem>>, vector<1x8x128xf32>
    tpu.vector_store %arg20[%c0_66, %c0_67, %c0_68], %142 {strides = array<i32>} : memref<1x8x128xf32, #tpu.memory_space<vmem>>, vector<1x8x128xf32>,
    return
  }
  func.func @transform_0(%arg0: i32) -> (i32, i32, i32) {
    %c0_i32 = arith.constant 0 : i32
    %c0_i32_0 = arith.constant 0 : i32
    %c0_i32_1 = arith.constant 0 : i32
    return %arg0, %c0_i32, %c0_i32_0 : i32, i32, i32
  }
  func.func @transform_1(%arg0: i32) -> (i32, i32) {
    %c0_i32 = arith.constant 0 : i32
    %c0_i32_0 = arith.constant 0 : i32
    %c0_i32_1 = arith.constant 0 : i32
    return %c0_i32, %c0_i32_0 : i32, i32
  }
  func.func @transform_2(%arg0: i32) -> (i32, i32) {
    %c0_i32 = arith.constant 0 : i32
    %c0_i32_0 = arith.constant 0 : i32
    %c0_i32_1 = arith.constant 0 : i32
    return %c0_i32, %c0_i32_0 : i32, i32
  }
  func.func @transform_3(%arg0: i32) -> (i32, i32) {
    %c0_i32 = arith.constant 0 : i32
    %c0_i32_0 = arith.constant 0 : i32
    %c0_i32_1 = arith.constant 0 : i32
    return %c0_i32, %c0_i32_0 : i32, i32
  }
  func.func @transform_4(%arg0: i32) -> (i32, i32) {
    %c0_i32 = arith.constant 0 : i32
    %c0_i32_0 = arith.constant 0 : i32
    %c0_i32_1 = arith.constant 0 : i32
    return %c0_i32, %c0_i32_0 : i32, i32
  }
  func.func @transform_5(%arg0: i32) -> (i32, i32) {
    %c0_i32 = arith.constant 0 : i32
    %c0_i32_0 = arith.constant 0 : i32
    %c0_i32_1 = arith.constant 0 : i32
    return %c0_i32, %c0_i32_0 : i32, i32
  }
  func.func @transform_6(%arg0: i32) -> (i32, i32) {
    %c0_i32 = arith.constant 0 : i32
    %c0_i32_0 = arith.constant 0 : i32
    %c0_i32_1 = arith.constant 0 : i32
    return %c0_i32, %c0_i32_0 : i32, i32
  }
  func.func @transform_7(%arg0: i32) -> (i32, i32) {
    %c0_i32 = arith.constant 0 : i32
    %c0_i32_0 = arith.constant 0 : i32
    %c0_i32_1 = arith.constant 0 : i32
    return %c0_i32, %c0_i32_0 : i32, i32
  }
  func.func @transform_8(%arg0: i32) -> (i32, i32) {
    %c0_i32 = arith.constant 0 : i32
    %c0_i32_0 = arith.constant 0 : i32
    %c0_i32_1 = arith.constant 0 : i32
    return %c0_i32, %c0_i32_0 : i32, i32
  }
  func.func @transform_9(%arg0: i32) -> (i32, i32) {
    %c0_i32 = arith.constant 0 : i32
    %c0_i32_0 = arith.constant 0 : i32
    %c0_i32_1 = arith.constant 0 : i32
    return %c0_i32, %c0_i32_0 : i32, i32
  }
  func.func @transform_10(%arg0: i32) -> (i32, i32) {
    %c0_i32 = arith.constant 0 : i32
    %c0_i32_0 = arith.constant 0 : i32
    %c0_i32_1 = arith.constant 0 : i32
    return %c0_i32, %c0_i32_0 : i32, i32
  }
  func.func @transform_11(%arg0: i32) -> (i32, i32) {
    %c0_i32 = arith.constant 0 : i32
    %c0_i32_0 = arith.constant 0 : i32
    %c0_i32_1 = arith.constant 0 : i32
    return %c0_i32, %c0_i32_0 : i32, i32
  }
  func.func @transform_12(%arg0: i32) -> (i32, i32) {
    %c0_i32 = arith.constant 0 : i32
    %c0_i32_0 = arith.constant 0 : i32
    %c0_i32_1 = arith.constant 0 : i32
    return %c0_i32, %c0_i32_0 : i32, i32
  }
  func.func @transform_13(%arg0: i32) -> (i32, i32) {
    %c0_i32 = arith.constant 0 : i32
    %c0_i32_0 = arith.constant 0 : i32
    %c0_i32_1 = arith.constant 0 : i32
    return %c0_i32, %c0_i32_0 : i32, i32
  }
  func.func @transform_14(%arg0: i32) -> (i32, i32) {
    %c0_i32 = arith.constant 0 : i32
    %c0_i32_0 = arith.constant 0 : i32
    %c0_i32_1 = arith.constant 0 : i32
    return %c0_i32, %c0_i32_0 : i32, i32
  }
  func.func @transform_15(%arg0: i32) -> (i32, i32) {
    %c0_i32 = arith.constant 0 : i32
    %c0_i32_0 = arith.constant 0 : i32
    %c0_i32_1 = arith.constant 0 : i32
    return %c0_i32, %c0_i32_0 : i32, i32
  }
  func.func @transform_16(%arg0: i32) -> (i32, i32) {
    %c0_i32 = arith.constant 0 : i32
    %c0_i32_0 = arith.constant 0 : i32
    %c0_i32_1 = arith.constant 0 : i32
    return %c0_i32, %c0_i32_0 : i32, i32
  }
  func.func @transform_17(%arg0: i32) -> (i32, i32) {
    %c0_i32 = arith.constant 0 : i32
    %c0_i32_0 = arith.constant 0 : i32
    %c0_i32_1 = arith.constant 0 : i32
    return %c0_i32, %c0_i32_0 : i32, i32
  }
  func.func @transform_18(%arg0: i32) -> (i32, i32) {
    %c0_i32 = arith.constant 0 : i32
    %c0_i32_0 = arith.constant 0 : i32
    %c0_i32_1 = arith.constant 0 : i32
    return %c0_i32, %c0_i32_0 : i32, i32
  }
  func.func @transform_19(%arg0: i32) -> (i32, i32, i32) {
    %c0_i32 = arith.constant 0 : i32
    %c0_i32_0 = arith.constant 0 : i32
    %c0_i32_1 = arith.constant 0 : i32
    return %arg0, %c0_i32, %c0_i32_0 : i32, i32, i32
  }
}

</mosaic_0001>

<bundles_post_ra>
// kernel: tpu_custom_call.1
= control target key start
LH: loop header
LB: loop body
LE: loop exit
PB: predicated region body
PF: predicated region fallthrough
CT: control target
= control target key end

     0   :  { %s3586_s0 = inlined_call_operand.vmem [shape: f32[2,8,32], index: 0, kind: input, shape index: {}]   ;;  %s3587_s1 = inlined_call_operand.vmem [shape: f32[1,32], index: 1, kind: input, shape index: {}]   ;;  %s3588_s2 = inlined_call_operand.vmem [shape: f32[1,32], index: 2, kind: input, shape index: {}]   ;;  %s3589_s3 = inlined_call_operand.vmem [shape: bf16[32,32], index: 3, kind: input, shape index: {}]   ;;  %s3590_s4 = inlined_call_operand.vmem [shape: f32[32,1], index: 4, kind: input, shape index: {}]   ;;  %s3591_s5 = inlined_call_operand.vmem [shape: bf16[32,32], index: 5, kind: input, shape index: {}]   ;;  %s3592_s6 = inlined_call_operand.vmem [shape: f32[32,1], index: 6, kind: input, shape index: {}]   ;;  %s3593_s7 = inlined_call_operand.vmem [shape: bf16[32,32], index: 7, kind: input, shape index: {}]   ;;  %s3594_s8 = inlined_call_operand.vmem [shape: f32[32,1], index: 8, kind: input, shape index: {}]   ;;  %s3595_s9 = inlined_call_operand.vmem [shape: bf16[32,32], index: 9, kind: input, shape index: {}]   ;;  %s3596_s10 = inlined_call_operand.vmem [shape: f32[1,32], index: 10, kind: input, shape index: {}]   ;;  %s3597_s11 = inlined_call_operand.vmem [shape: f32[1,32], index: 11, kind: input, shape index: {}]   ;;  %s3598_s12 = inlined_call_operand.vmem [shape: f32[1,32], index: 12, kind: input, shape index: {}]   ;;  %s3599_s13 = inlined_call_operand.vmem [shape: bf16[32,128], index: 13, kind: input, shape index: {}]   ;;  %s3600_s14 = inlined_call_operand.vmem [shape: f32[1,128], index: 14, kind: input, shape index: {}]   ;;  %s3601_s15 = inlined_call_operand.vmem [shape: bf16[128,32], index: 15, kind: input, shape index: {}]   ;;  %s3602_s16 = inlined_call_operand.vmem [shape: f32[1,32], index: 16, kind: input, shape index: {}]   ;;  %s3603_s17 = inlined_call_operand.vmem [shape: bf16[32,128], index: 17, kind: input, shape index: {}]   ;;  %s3604_s18 = inlined_call_operand.vmem [shape: f32[1,128], index: 18, kind: input, shape index: {}]   ;;  %s3605_s19 = inlined_call_operand.hbm [shape: f32[2,8,128], index: 19, kind: output, shape index: {}]  }
   0x1   :  { %3612 = sst [smem:[#allocation10_spill]] %s3586_s0 }
   0x2   :  { %3613 = sst [smem:[#allocation11_spill]] %s3587_s1 }
   0x3   :  { %3614 = sst [smem:[#allocation12_spill]] %s3588_s2 }
   0x4   :  { %3615 = sst [smem:[#allocation13_spill]] %s3589_s3 }
   0x5   :  { %24 = vsyncpa [#allocation3], 0 }
   0x6   :  { %26 = vsyncpa [#allocation3 + $0x1], 0  ;;  %s3191_s0 = smov 0   ;;  %s3193_s30 = smov 0  }
   0x7   :  { %s3195_s20 = smov 0   ;;  %s3197_s21 = smov 0  }
   0x8 LB: > { %3616 = sst [smem:[#allocation5_spill]] %s3072_s0  ;;  %s3212_s1 = sadd.s32 4294967295, %s3084_s21   ;;  %s3084_s21 = sphi %s3197_s21, %s3629_s21   ;;  %s3080_s20 = sphi %s3195_s20, %s3634_s20   ;;  %s3076_s30 = sphi %s3193_s30, %s3633_s30   ;;  %s3072_s0 = sphi %s3191_s0, %s3632_s0  }
   0x9   : > { %3617 = sst [smem:[#allocation6_spill]] %s3080_s20  ;;  %s2628_s22 = sadd.s32 4294967294, %s3084_s21  }
   0xa   : > { %s3216_s2 = sadd.s32 1, %s3084_s21   ;;  %s443_s23 = sadd.s32 1, %s3080_s20 }
   0xb   : > { %3618 = sst [smem:[#allocation7_spill]] %s3216_s2  ;;  %s440_s24 = ssub.s32 %s3084_s21, %s3216_s2 }
   0xc   : > { %p453_p0 = scmp.ne.s32.totalorder %s3080_s20, %s3076_s30  ;;  %p441_p1 = scmp.eq.s32.totalorder %s440_s24, 0 }
   0xd   : > { %p454_p2 = scmp.eq.s32.totalorder %s3212_s1, 1  ;;  %p459_p3 = scmp.ne.s32.totalorder %s3076_s30, %s3072_s0 }
   0xe   : > { %p460_p4 = scmp.eq.s32.totalorder %s2628_s22, 1  ;;  %p2631_p7 = scmp.ge.s32.totalorder %s3084_s21, 1 }
   0xf   : > { %s3227_s25 = scalar_select %p441_p1, %s3080_s20, %s443_s23  }
  0x10   : > { %p3229_p5 = por %p454_p2, %p453_p0  ;;  %p3233_p6 = por %p460_p4, %p459_p3 }
  0x11   : > { %3619 = sst [smem:[#allocation8_spill]] %s3227_s25  ;;  %p539_p8 = scmp.lt.s32.totalorder %s3084_s21, 3 }
  0x12   : > { %s3621_s26 = scalar_select %p3233_p6, 1, 0 }
  0x13   : > { %p540_p9 = pnand %p2631_p7, %p539_p8 }
  0x14   : > { %3622 = sst [smem:[#allocation9_spill]] %s3621_s26  ;;  %p594_p10 = scmp.lt.s32.totalorder (!%p540_p9), %s3212_s1, 1  ;;  %vm602_vm0 = vcmask (!%p540_p9), 261120   ;;  %v636_v8 = vld [vmem:[%s3590_s4] sm:$0xff] (!%p540_p9)  ;;  %v3086_v9 = vmov (!%p540_p9), 0   ;;  %v638_v10 = vld [vmem:[%s3590_s4 + $0x10] sm:$0xff] (!%p540_p9)  ;;  %v736_v40 = vlaneseq (!%p540_p9) }
  0x15   : > { %543 = sbr.rel (%p540_p9) target bundleno = 2786 (0xae2), region = 96  ;;  %s3623_s23 = sld [smem:[#allocation10_spill]] (!%p540_p9)  ;;  %2960 = vset.pattern.permute.xlu1 (!%p540_p9), %v3086_v9  ;;  %2961 = vset.pattern.permute.xlu0 (!%p540_p9), %v3086_v9  ;;  %v637_v11 = vld [vmem:[%s3590_s4 + $0x8] sm:$0xff] (!%p540_p9)  ;;  %v639_v12 = vld [vmem:[%s3590_s4 + $0x18] sm:$0xff] (!%p540_p9)  ;;  %v906_v13 = vld [vmem:[%s3592_s6] sm:$0xff] (!%p540_p9)  ;;  %v3087_v33 = vmov (!%p540_p9), 0.0  }
  0x16   : > { %s3624_s2 = sld [smem:[#allocation13_spill]] (!%p540_p9)  ;;  %642 = vperm.xlu1 (!%p540_p9), %2960, %v636_v8   ;;  %v907_v14 = vld [vmem:[%s3592_s6 + $0x8] sm:$0xff] (!%p540_p9)  ;;  %v908_v15 = vld [vmem:[%s3592_s6 + $0x10] sm:$0xff] (!%p540_p9)  ;;  %v909_v16 = vld [vmem:[%s3592_s6 + $0x18] sm:$0xff] (!%p540_p9)  ;;  %s3625_s0 = sld [smem:[#allocation11_spill]] (!%p540_p9)  ;;  %2774 = vmatprep.subr.bf16.mxu1 (!%p540_p9), %v3087_v33  ;;  %vm3088_vm1 = vmmov (!%p540_p9), 0  }
  0x17   : > { %s3626_s29 = sld [smem:[#allocation12_spill]] (!%p540_p9)  ;;  %v2964_v29 = vld [vmem:[%s3591_s5] sm:$0xff] (!%p540_p9)   ;;  %v2965_v30 = vld [vmem:[%s3591_s5 + $0x8] sm:$0xff] (!%p540_p9)   ;;  %2776 = vmatprep.mubr.msk.bf16.mxu1 (!%p540_p9), %vm3088_vm1, %v3087_v33  ;;  %v3089_v38 = vmov (!%p540_p9), 1983009808   ;;  %v737_v45 = vshrl.u32 (!%p540_p9), %v736_v40, 7 }
  0x18   : > { %v2966_v31 = vld [vmem:[%s3593_s7] sm:$0xff] (!%p540_p9)   ;;  %v2967_v32 = vld [vmem:[%s3593_s7 + $0x8] sm:$0xff] (!%p540_p9)   ;;  %v734_v39 = vunpack.c.l.s4 (!%p540_p9), %v3089_v38  ;;  %vm1168_vm2 = vcmask (!%p540_p9), 1041408   ;;  %vm1164_vm3 = vcmask (!%p540_p9), 31744   ;;  %vm1534_vm4 = vcmask (!%p540_p9), 64512  }
  0x19   : > { %v1037_v38 = vld [vmem:[%s3594_s8] sm:$0xff] (!%p540_p9) }
  0x1a   : > { %647 = vperm.xlu1 (!%p540_p9), %2960, %v637_v11   ;;  %v735_v44 = vunpack.c.0.s8 (!%p540_p9), %v734_v39 }
  0x1c   : > { %s595_s27 = scalar_select %p594_p10, %s3212_s1, 1  ;;  %v2962_v7 = vld [vmem:[%s3624_s2] sm:$0xff]   ;;  %v2963_v28 = vld [vmem:[%s3624_s2 + $0x8] sm:$0xff]   ;;  %v3310_v53 = vsub.s32 %v735_v44, %v737_v45 }
  0x1d   : > { %2758 = vmatprep.mubr.msk.bf16.mxu0 %vm602_vm0, %v2962_v7  ;;  %v2634_v21 = vld [vmem:[%s3625_s0] ss:$0 sm:$0xff]  ;;  %s591_s0 = sand.u32 1, %s3076_s30  }
  0x1e   : > { %s2633_s28 = sshll.u32 %s595_s27, 3  ;;  %657 = vperm.xlu1 %2960, %v639_v12   ;;  %v2635_v23 = vld [vmem:[%s3626_s29] ss:$0 sm:$0xff]  ;;  %s2632_s26 = sshll.u32 %s591_s0, 3 }
  0x1f   : > { %s597_s24 = scalar_lea.vmem %s3623_s23, %s2633_s28  ;;  %s2694_s28 = sshll.u32 %s3212_s1, 7 }
  0x20   : > { %v599_v0 = vld [vmem:[%s597_s24] sm:$0xff]  ;;  %s593_s22 = scalar_lea.vmem [#allocation2], %s2632_s26  ;;  %s3544_s25 = scalar_lea.hbm %s3605_s19, %s2694_s28 }
  0x21   : > { %v603_v1 = vsel %vm602_vm0, %v599_v0, 0.0  ;;  %s2569_s23 = sshll.u32 %s593_s22, 4  ;;  %s2556_s27 = scalar_lea.sflag [#allocation3], %s591_s0  ;;  %s3546_s23 = int_to_ptr.vmem [resolvable:$true] %s2569_s23 }
  0x22   : > { %604 = vadd.xlane.f32.xlu0 %v603_v1  ;;  %912 = vperm.xlu1 %2960, %v906_v13   ;;  %s3022_s1 = scalar_lea.vmem %s3546_s23, 128  ;;  %s3090_s26 = smov [#allocation2]  }
  0x23   : > { %p3023_p11 = scmp.ne.s32.totalorder %s3546_s23, %s3022_s1  ;;  %s3026_s29 = sshll.u32 %s3090_s26, 4  ;;  %s3027_s29 = int_to_ptr.vmem [resolvable:$false] %s3026_s29 }
  0x24   : > { %s3028_s24 = scalar_lea.vmem %s3027_s29, 256  ;;  %p3029_p0 = scmp.lt.s32.totalorder %s3546_s23, %s3027_s29 }
  0x25   : > { %p3024_p12 = pnand %p3023_p11, %p3229_p5  ;;  %p3030_p1 = scmp.lt.s32.totalorder %s3028_s24, %s3022_s1 }
  0x26   : > { %917 = vperm.xlu1 %2960, %v907_v14  }
  0x27   : > { %p3025_p13 = pneg %p3024_p12  ;;  %p3031_p2 = por %p3030_p1, %p3029_p0 }
  0x29   : > { %p3032_p3 = pnand %p3031_p2, %p3025_p13 }
  0x2a   : > { %922 = vperm.xlu1 %2960, %v908_v15  }
  0x2e   : > { %927 = vperm.xlu1 %2960, %v909_v16  }
  0x95   : > { %v643_v34 = vpop.permute.xlu1 %642 }
  0x99   : > { %v648_v35 = vpop.permute.xlu1 %647 }
  0x9d   : > { %v658_v36 = vpop.permute.xlu1 %657 }
  0xa1   : > { %v913_v37 = vpop.permute.xlu1 %912 }
  0xa5   : > { %v918_v41 = vpop.permute.xlu1 %917 }
  0xa9   : > { %v923_v51 = vpop.permute.xlu1 %922 }
  0xad   : > { %v928_v62 = vpop.permute.xlu1 %927 }
  0xaf   : > { %v605_v2 = vpop.xlane.xlu0 %604 }
  0xb0   : > { %v607_v3 = vmul.f32 0.03125, %v605_v2 }
  0xb2   : > { %v608_v4 = vsub.f32 %v599_v0, %v607_v3 }
  0xb4   : > { %v609_v5 = vmul.f32 %v608_v4, %v608_v4 }
  0xb6   : > { %v610_v6 = vsel %vm602_vm0, %v609_v5, 0.0 }
  0xb7   : > { %611 = vadd.xlane.f32.xlu0 %v610_v6 }
  0xcd   : > { %652 = vperm.xlu0 %2961, %v638_v10  }
 0x144   : > { %v612_v17 = vpop.xlane.xlu0 %611 }
 0x145   : > { %v613_v18 = vmul.f32 0.03125, %v612_v17 }
 0x147   : > { %v614_v19 = vadd.f32 1e-05, %v613_v18 }
 0x149   : > { %2982 = vrsqrt.f32 %v614_v19 }
 0x14c   : > { %v653_v43 = vpop.permute.xlu0 %652 }
 0x153   : > { %v2983_v20 = vpop.eup %2982 }
 0x154   : > { %v616_v22 = vmul.f32 %v2983_v20, %v608_v4 }
 0x156   : > { %v623_v24 = vmul.f32 %v2634_v21, %v616_v22 }
 0x158   : > { %v630_v25 = vadd.f32 %v2635_v23, %v623_v24 }
 0x15a   : > { %v631_v26 = vpack.c.bf16 %v630_v25, %v630_v25 }
 0x15c   : > { %2914 = vmatprep.subr.msk.bf16.mxu0 %vm602_vm0, %v631_v26  ;;  %v677_v27 = vsel %vm602_vm0, %v631_v26, 0 }
 0x15d   : > { %2757 = vmatpush3.bf16.xpose.msra.mxu0 %v677_v27 }
 0x15e   : > { %2915 = vmatprep.subr.msk.bf16.mxu0 %vm602_vm0, %v631_v26 }
 0x164   : > { %2759 = vmatmul.mubr.msk.bf16.vlgmr.msra.gmra.mrb[0].mxu0 %vm602_vm0, %v2963_v28 }
 0x165   : > { %2763 = vmatpush3.bf16.xpose.msra.mxu0 %v677_v27  ;;  %2764 = vmatprep.mubr.msk.bf16.mxu0 %vm602_vm0, %v2964_v29 }
 0x166   : > { %2916 = vmatprep.subr.msk.bf16.mxu0 %vm602_vm0, %v631_v26 }
 0x16c   : > { %2765 = vmatmul.mubr.msk.bf16.vlgmr.msra.gmra.mrb[4].mxu0 %vm602_vm0, %v2965_v30 }
 0x16d   : > { %2769 = vmatpush3.bf16.xpose.msra.mxu0 %v677_v27  ;;  %2770 = vmatprep.mubr.msk.bf16.mxu0 %vm602_vm0, %v2966_v31 }
 0x16e   : > { %2780 = vmatprep.subr.bf16.mxu0 %v3087_v33 }
 0x174   : > { %2771 = vmatmul.mubr.msk.bf16.vlgmr.msra.gmra.mrb[8].mxu0 %vm602_vm0, %v2967_v32 }
 0x175   : > { %2782 = vmatprep.mubr.msk.bf16.mxu0 %vm3088_vm1, %v3087_v33 }
 0x237   : > { %v2760_v42 = vpop.f32.mrb[0].mxu0 }
 0x238   : > { %v713_v46 = vpop.f32.mrb[1].mxu0  ;;  %v722_v48 = vadd.f32 %v2760_v42, %v653_v43 }
 0x239   : > { %v2761_v47 = vpop.f32.mrb[2].mxu0  ;;  %v714_v52 = vadd.f32 %v713_v46, %v643_v34 }
 0x23a   : > { %v725_v49 = vadd.f32 %v2761_v47, %v658_v36  ;;  %v716_v50 = vpop.f32.mrb[3].mxu0  ;;  %v1038_v36 = vld [vmem:[%s3594_s8 + $0x8] sm:$0xff] }
 0x23b   : > { %v717_v54 = vadd.f32 %v716_v50, %v648_v35 }
 0x23c   : > { %v729_v55 = vpack.c.bf16 %v725_v49, %v722_v48  ;;  %v2641_v56 = vpack.c.bf16 %v725_v49, %v725_v49 }
 0x23d   : > { %v728_v57 = vpack.c.bf16 %v717_v54, %v714_v52  ;;  %v2640_v58 = vpack.c.bf16 %v717_v54, %v717_v54 }
 0x23e   : > { %v763_v63 = vrot.slane %v2641_v56, %v3310_v53  ;;  %v756_v34 = vrot.slane %v729_v55, %v3310_v53 }
 0x23f   : > { %v2766_v59 = vpop.f32.mrb[4].mxu0  ;;  %v739_v60 = vrot.slane %v728_v57, %v3310_v53  ;;  %v746_v7 = vrot.slane %v2640_v58, %v3310_v53 }
 0x240   : > { %v980_v61 = vpop.f32.mrb[5].mxu0  ;;  %v989_v2 = vadd.f32 %v2766_v59, %v923_v51  ;;  %v765_v12 = vcombine.high %v763_v63, %v763_v63 }
 0x241   : > { %v2767_v0 = vpop.f32.mrb[6].mxu0  ;;  %774 = vxpose.xlu1.c.b16.start.end [1/1] (short) (narrow) %v739_v60, 16  ;;  %v747_v1 = vcombine.high %v739_v60, %v739_v60  ;;  %v981_v5 = vadd.f32 %v980_v61, %v913_v37  ;;  %v748_v16 = vcombine.high %v746_v7, %v746_v7  ;;  %v764_v37 = vcombine.high %v756_v34, %v756_v34 }
 0x242   : > { %v992_v3 = vadd.f32 %v2767_v0, %v928_v62  ;;  %v983_v4 = vpop.f32.mrb[7].mxu0 }
 0x243   : > { %v984_v6 = vadd.f32 %v983_v4, %v918_v41  ;;  %790 = vxpose.xlu0.c.b16.start.end [1/1] (short) (narrow) %v747_v1, 16 }
 0x244   : > { %v996_v8 = vpack.c.bf16 %v992_v3, %v989_v2  ;;  %v2647_v9 = vpack.c.bf16 %v992_v3, %v992_v3 }
 0x245   : > { %v995_v10 = vpack.c.bf16 %v984_v6, %v981_v5  ;;  %v2646_v11 = vpack.c.bf16 %v984_v6, %v984_v6  ;;  %806 = vxpose.xlu1.c.b16.start.end [1/1] (short) (narrow) %v746_v7, 16 }
 0x246   : > { %v1023_v13 = vrot.slane %v996_v8, %v3310_v53  ;;  %v1030_v14 = vrot.slane %v2647_v9, %v3310_v53 }
 0x247   : > { %v1013_v15 = vrot.slane %v2646_v11, %v3310_v53  ;;  %886 = vxpose.xlu0.c.b16.start.end [1/1] (short) (narrow) %v765_v12, 16  ;;  %v1006_v17 = vrot.slane %v995_v10, %v3310_v53  ;;  %v3319_v18 = vpop.f32.mrb[8].mxu0 }
 0x248   : > { %v1354_v19 = vsel %vm1168_vm2, %v1023_v13, 0  ;;  %v1031_v20 = vcombine.high %v1023_v13, %v1023_v13  ;;  %v1446_v21 = vsel %vm1168_vm2, %v1030_v14, 0  ;;  %v1032_v22 = vcombine.high %v1030_v14, %v1030_v14  ;;  %v3323_v23 = vpop.f32.mrb[9].mxu0 }
 0x249   : > { %822 = vxpose.xlu1.c.b16.start.end [1/1] (short) (narrow) %v748_v16, 16  ;;  %v1014_v24 = vcombine.high %v1006_v17, %v1006_v17  ;;  %v1170_v25 = vsel %vm1168_vm2, %v1006_v17, 0  ;;  %v1262_v26 = vsel %vm1168_vm2, %v1013_v15, 0  ;;  %v1015_v27 = vcombine.high %v1013_v15, %v1013_v15  ;;  %v3327_v28 = vpop.f32.mrb[10].mxu0 }
 0x24a   : > { %2775 = vmatpush3.bf16.msra.mxu1 %v1170_v25  ;;  %v1400_v29 = vsel %vm1168_vm2, %v1031_v20, 0  ;;  %v1492_v30 = vsel %vm1168_vm2, %v1032_v22, 0  ;;  %v1114_v31 = vpop.f32.mrb[11].mxu0 }
 0x24b   : > { %v1216_v32 = vsel %vm1168_vm2, %v1014_v24, 0  ;;  %2786 = vmatprep.subr.bf16.mxu1 %v3087_v33  ;;  %v1308_v35 = vsel %vm1168_vm2, %v1015_v27, 0 }
 0x24c   : > { %2781 = vmatpush3.bf16.msra.mxu0 %v1216_v32 }
 0x24d   : > { %838 = vxpose.xlu1.c.b16.start.end [1/1] (short) (narrow) %v756_v34, 16  ;;  %2792 = vmatprep.subr.bf16.mxu0 %v3087_v33  ;;  %v1039_v34 = vld [vmem:[%s3594_s8 + $0x10] sm:$0xff] }
 0x250   : > { %1048 = vperm.xlu0 %2961, %v1038_v36  }
 0x251   : > { %854 = vxpose.xlu1.c.b16.start.end [1/1] (short) (narrow) %v764_v37, 16 }
 0x255   : > { %870 = vxpose.xlu1.c.b16.start.end [1/1] (short) (narrow) %v763_v63, 16 }
 0x259   : > { %1043 = vperm.xlu1 %2960, %v1037_v38  }
 0x2a7   : > { %v782_v39 = vpop.trf.xlu1 }
 0x2a8   : > { %2777 = vmatmul.mubr.msk.bf16.vlgmr.msra.gmra.mrb[0].mxu1 %vm1164_vm3, %v782_v39 }
 0x2a9   : > { %2787 = vmatpush3.bf16.msra.mxu1 %v1262_v26  ;;  %v798_v40 = vpop.trf.xlu0  ;;  %2788 = vmatprep.mubr.msk.bf16.mxu1 %vm3088_vm1, %v3087_v33 }
 0x2aa   : > { %2783 = vmatmul.mubr.msk.bf16.vlgmr.msra.gmra.mrb[12].mxu0 %vm1164_vm3, %v798_v40  ;;  %2798 = vmatprep.subr.bf16.mxu1 %v3087_v33 }
 0x2ab   : > { %2793 = vmatpush3.bf16.msra.mxu0 %v1308_v35  ;;  %v814_v41 = vpop.trf.xlu1  ;;  %2794 = vmatprep.mubr.msk.bf16.mxu0 %vm3088_vm1, %v3087_v33  ;;  %v1040_v35 = vld [vmem:[%s3594_s8 + $0x18] sm:$0xff] }
 0x2ac   : > { %2804 = vmatprep.subr.bf16.mxu0 %v3087_v33 }
 0x2ad   : > { %v894_v46 = vpop.trf.xlu0 }
 0x2af   : > { %v830_v42 = vpop.trf.xlu1 }
 0x2b0   : > { %2789 = vmatmul.mubr.msk.bf16.vlgmr.msra.gmra.mrb[4].mxu1 %vm1164_vm3, %v814_v41 }
 0x2b1   : > { %2799 = vmatpush3.bf16.msra.mxu1 %v1354_v19  ;;  %2800 = vmatprep.mubr.msk.bf16.mxu1 %vm3088_vm1, %v3087_v33 }
 0x2b2   : > { %2795 = vmatmul.mubr.msk.bf16.vlgmr.msra.gmra.mrb[16].mxu0 %vm1164_vm3, %v830_v42  ;;  %2810 = vmatprep.subr.bf16.mxu1 %v3087_v33 }
 0x2b3   : > { %2805 = vmatpush3.bf16.msra.mxu0 %v1400_v29  ;;  %v846_v43 = vpop.trf.xlu1  ;;  %2806 = vmatprep.mubr.msk.bf16.mxu0 %vm3088_vm1, %v3087_v33 }
 0x2b4   : > { %2816 = vmatprep.subr.bf16.mxu0 %v3087_v33 }
 0x2b7   : > { %v862_v44 = vpop.trf.xlu1 }
 0x2b8   : > { %2801 = vmatmul.mubr.msk.bf16.vlgmr.msra.gmra.mrb[8].mxu1 %vm1164_vm3, %v846_v43 }
 0x2b9   : > { %2811 = vmatpush3.bf16.msra.mxu1 %v1446_v21  ;;  %2812 = vmatprep.mubr.msk.bf16.mxu1 %vm3088_vm1, %v3087_v33 }
 0x2ba   : > { %2807 = vmatmul.mubr.msk.bf16.vlgmr.msra.gmra.mrb[20].mxu0 %vm1164_vm3, %v862_v44  ;;  %2822 = vmatprep.subr.bf16.mxu1 %v3087_v33 }
 0x2bb   : > { %2817 = vmatpush3.bf16.msra.mxu0 %v1492_v30  ;;  %2818 = vmatprep.mubr.msk.bf16.mxu0 %vm3088_vm1, %v3087_v33  ;;  %v878_v45 = vpop.trf.xlu1 }
 0x2bc   : > { %2828 = vmatprep.subr.bf16.mxu0 %v3087_v33 }
 0x2c0   : > { %2813 = vmatmul.mubr.msk.bf16.vlgmr.msra.gmra.mrb[12].mxu1 %vm1164_vm3, %v878_v45 }
 0x2c1   : > { %2824 = vmatprep.mubr.msk.bf16.mxu1 %vm3088_vm1, %v3087_v33 }
 0x2c2   : > { %2819 = vmatmul.mubr.msk.bf16.vlgmr.msra.gmra.mrb[24].mxu0 %vm1164_vm3, %v894_v46 }
 0x2c3   : > { %2830 = vmatprep.mubr.msk.bf16.mxu0 %vm3088_vm1, %v3087_v33 }
 0x2cf   : > { %v1049_v47 = vpop.permute.xlu0 %1048 }
 0x2d0   : > { %v3372_v49 = vadd.f32 %v1114_v31, %v1049_v47 }
 0x2d2   : > { %v2652_v44 = vpack.c.bf16 %v3372_v49, %v3372_v49 }
 0x2d8   : > { %v1044_v48 = vpop.permute.xlu1 %1043 }
 0x2d9   : > { %v1112_v50 = vadd.f32 %v3323_v23, %v1044_v48 }
 0x2db   : > { %v1126_v51 = vpack.c.bf16 %v3372_v49, %v1112_v50 }
 0x2dd   : > { %v1137_v52 = vrot.slane %v1126_v51, %v3310_v53  ;;  %v1144_v51 = vrot.slane %v2652_v44, %v3310_v53 }
 0x2df   : > { %v1619_v54 = vsel %vm1534_vm4, %v1137_v52, 0  ;;  %v1145_v55 = vcombine.high %v1137_v52, %v1137_v52  ;;  %v1711_v49 = vsel %vm1534_vm4, %v1144_v51, 0 }
 0x2e0   : > { %2823 = vmatpush3.bf16.xpose.msra.mxu1 %v1619_v54 }
 0x2e1   : > { %v1665_v56 = vsel %vm1534_vm4, %v1145_v55, 0  ;;  %2834 = vmatprep.subr.bf16.mxu1 %v3087_v33 }
 0x2e2   : > { %2829 = vmatpush3.bf16.xpose.msra.mxu0 %v1665_v56 }
 0x2e3   : > { %2840 = vmatprep.subr.bf16.mxu0 %v3087_v33 }
 0x37b   : > { %v1206_v57 = vpop.f32.mrb[0].mxu1 }
 0x37c   : > { %v2778_v58 = vpop.f32.mrb[1].mxu1  ;;  %v1535_v59 = vsel %vm1534_vm4, %v1206_v57, -inf }
 0x37d   : > { %v1209_v60 = vpop.f32.mrb[2].mxu1  ;;  %1536 = vmax.xlane.f32.xlu1 %v1535_v59  ;;  %v1252_v61 = vpop.f32.mrb[12].mxu0  ;;  %v1146_v58 = vcombine.high %v1144_v51, %v1144_v51 }
 0x37e   : > { %v2779_v62 = vpop.f32.mrb[3].mxu1  ;;  %v2784_v63 = vpop.f32.mrb[13].mxu0  ;;  %v1538_v0 = vsel %vm1534_vm4, %v1252_v61, -inf }
 0x37f   : > { %1539 = vmax.xlane.f32.xlu0 %v1538_v0  ;;  %v1255_v1 = vpop.f32.mrb[14].mxu0 }
 0x380   : > { %v2785_v2 = vpop.f32.mrb[15].mxu0 }
 0x381   : > { %v1757_v2 = vsel %vm1534_vm4, %v1146_v58, 0 }
 0x383   : > { %v1298_v3 = vpop.f32.mrb[4].mxu1 }
 0x384   : > { %v2790_v4 = vpop.f32.mrb[5].mxu1  ;;  %v1541_v5 = vsel %vm1534_vm4, %v1298_v3, -inf }
 0x385   : > { %v1301_v6 = vpop.f32.mrb[6].mxu1  ;;  %1542 = vmax.xlane.f32.xlu1 %v1541_v5  ;;  %v1344_v7 = vpop.f32.mrb[16].mxu0 }
 0x386   : > { %v2791_v8 = vpop.f32.mrb[7].mxu1  ;;  %v2796_v9 = vpop.f32.mrb[17].mxu0  ;;  %v1544_v10 = vsel %vm1534_vm4, %v1344_v7, -inf }
 0x387   : > { %1545 = vmax.xlane.f32.xlu0 %v1544_v10  ;;  %v1347_v11 = vpop.f32.mrb[18].mxu0 }
 0x388   : > { %v2797_v12 = vpop.f32.mrb[19].mxu0 }
 0x38b   : > { %v1390_v13 = vpop.f32.mrb[8].mxu1 }
 0x38c   : > { %v2802_v14 = vpop.f32.mrb[9].mxu1  ;;  %v1547_v15 = vsel %vm1534_vm4, %v1390_v13, -inf }
 0x38d   : > { %v1393_v16 = vpop.f32.mrb[10].mxu1  ;;  %1548 = vmax.xlane.f32.xlu1 %v1547_v15  ;;  %v1436_v17 = vpop.f32.mrb[20].mxu0 }
 0x38e   : > { %v2803_v19 = vpop.f32.mrb[11].mxu1  ;;  %v2808_v20 = vpop.f32.mrb[21].mxu0  ;;  %v1550_v21 = vsel %vm1534_vm4, %v1436_v17, -inf }
 0x38f   : > { %1551 = vmax.xlane.f32.xlu0 %v1550_v21  ;;  %v1439_v22 = vpop.f32.mrb[22].mxu0 }
 0x390   : > { %v2809_v23 = vpop.f32.mrb[23].mxu0 }
 0x393   : > { %v3387_v24 = vpop.f32.mrb[12].mxu1 }
 0x394   : > { %v2814_v25 = vpop.f32.mrb[13].mxu1  ;;  %v1553_v36 = vsel %vm1534_vm4, %v3387_v24, -inf }
 0x395   : > { %v3389_v26 = vpop.f32.mrb[24].mxu0  ;;  %v1485_v27 = vpop.f32.mrb[14].mxu1 }
 0x396   : > { %v2820_v29 = vpop.f32.mrb[25].mxu0  ;;  %v2815_v30 = vpop.f32.mrb[15].mxu1  ;;  %v1556_v37 = vsel %vm1534_vm4, %v3389_v26, -inf }
 0x397   : > { %v1531_v31 = vpop.f32.mrb[26].mxu0 }
 0x398   : > { %v2821_v32 = vpop.f32.mrb[27].mxu0 }
 0x39e   : > { %1053 = vperm.xlu1 %2960, %v1039_v34  }
 0x3a5   : > { %1058 = vperm.xlu0 %2961, %v1040_v35  }
 0x3c2   : > { %1554 = vmax.xlane.f32.xlu1 %v1553_v36 }
 0x3c4   : > { %1557 = vmax.xlane.f32.xlu0 %v1556_v37 }
 0x40a   : > { %v1537_v38 = vpop.xlane.xlu1 %1536 }
 0x40b   : > { %v1559_v39 = vsub.f32 %v1206_v57, %v1537_v38 }
 0x40c   : > { %v1540_v40 = vpop.xlane.xlu0 %1539 }
 0x40d   : > { %v1567_v41 = vmul.f32 1.442695, %v1559_v39  ;;  %v1560_v42 = vsub.f32 %v1252_v61, %v1540_v40 }
 0x40f   : > { %2984 = vpow2.f32 %v1567_v41  ;;  %v1569_v43 = vmul.f32 1.442695, %v1560_v42 }
 0x411   : > { %2986 = vpow2.f32 %v1569_v43 }
 0x412   : > { %v1543_v45 = vpop.xlane.xlu1 %1542 }
 0x413   : > { %v1561_v46 = vsub.f32 %v1298_v3, %v1543_v45 }
 0x414   : > { %v1546_v47 = vpop.xlane.xlu0 %1545 }
 0x415   : > { %v1571_v48 = vmul.f32 1.442695, %v1561_v46  ;;  %v1562_v50 = vsub.f32 %v1344_v7, %v1546_v47 }
 0x417   : > { %2988 = vpow2.f32 %v1571_v48  ;;  %v1573_v52 = vmul.f32 1.442695, %v1562_v50 }
 0x419   : > { %v2985_v54 = vpop.eup %2984  ;;  %2990 = vpow2.f32 %v1573_v52 }
 0x41a   : > { %v1549_v55 = vpop.xlane.xlu1 %1548  ;;  %v1583_v56 = vsel %vm1534_vm4, %v2985_v54, 0.0  ;;  %v1607_v57 = vpack.c.bf16 %v2985_v54, %v2985_v54 }
 0x41b   : > { %v2987_v59 = vpop.eup %2986  ;;  %v1563_v60 = vsub.f32 %v1390_v13, %v1549_v55  ;;  %1584 = vadd.xlane.f32.xlu1 %v1583_v56 }
 0x41c   : > { %2825 = vmatmul.mubr.msk.bf16.vlgmr.msra.gmra.mrb[16].mxu1 %vm1534_vm4, %v1607_v57  ;;  %v1552_v61 = vpop.xlane.xlu0 %1551  ;;  %v1586_v62 = vsel %vm1534_vm4, %v2987_v59, 0.0  ;;  %v1608_v63 = vpack.c.bf16 %v2987_v59, %v2987_v59 }
 0x41d   : > { %v1575_v0 = vmul.f32 1.442695, %v1563_v60  ;;  %2835 = vmatpush3.bf16.xpose.msra.mxu1 %v1711_v49  ;;  %v1564_v1 = vsub.f32 %v1436_v17, %v1552_v61  ;;  %1587 = vadd.xlane.f32.xlu0 %v1586_v62 }
 0x41e   : > { %2831 = vmatmul.mubr.msk.bf16.vlgmr.msra.gmra.mrb[28].mxu0 %vm1534_vm4, %v1608_v63  ;;  %2836 = vmatprep.mubr.msk.bf16.mxu1 %vm3088_vm1, %v3087_v33  ;;  %v1054_v5 = vpop.permute.xlu1 %1053 }
 0x41f   : > { %2992 = vpow2.f32 %v1575_v0  ;;  %v1577_v3 = vmul.f32 1.442695, %v1564_v1  ;;  %2841 = vmatpush3.bf16.xpose.msra.mxu0 %v1757_v2  ;;  %2842 = vmatprep.mubr.msk.bf16.mxu0 %vm3088_vm1, %v3087_v33  ;;  %v1120_v12 = vadd.f32 %v3319_v18, %v1054_v5 }
 0x420   : > { %2846 = vmatprep.subr.bf16.mxu1 %v3087_v33  ;;  %2852 = vmatprep.subr.bf16.mxu0 %v3087_v33 }
 0x421   : > { %v2989_v4 = vpop.eup %2988  ;;  %2994 = vpow2.f32 %v1577_v3 }
 0x422   : > { %v1589_v6 = vsel %vm1534_vm4, %v2989_v4, 0.0  ;;  %v1609_v7 = vpack.c.bf16 %v2989_v4, %v2989_v4 }
 0x423   : > { %v2991_v8 = vpop.eup %2990  ;;  %1590 = vadd.xlane.f32.xlu1 %v1589_v6 }
 0x424   : > { %2837 = vmatmul.mubr.msk.bf16.vlgmr.msra.gmra.mrb[20].mxu1 %vm1534_vm4, %v1609_v7  ;;  %v1059_v9 = vpop.permute.xlu0 %1058  ;;  %v1592_v10 = vsel %vm1534_vm4, %v2991_v8, 0.0  ;;  %v1610_v11 = vpack.c.bf16 %v2991_v8, %v2991_v8 }
 0x425   : > { %v1123_v13 = vadd.f32 %v3327_v28, %v1059_v9  ;;  %1593 = vadd.xlane.f32.xlu0 %v1592_v10  ;;  %2848 = vmatprep.mubr.msk.bf16.mxu1 %vm3088_vm1, %v3087_v33 }
 0x426   : > { %2843 = vmatmul.mubr.msk.bf16.vlgmr.msra.gmra.mrb[32].mxu0 %vm1534_vm4, %v1610_v11 }
 0x427   : > { %v1127_v14 = vpack.c.bf16 %v1123_v13, %v1120_v12  ;;  %2854 = vmatprep.mubr.msk.bf16.mxu0 %vm3088_vm1, %v3087_v33  ;;  %v2653_v16 = vpack.c.bf16 %v1123_v13, %v1123_v13 }
 0x429   : > { %v2993_v15 = vpop.eup %2992  ;;  %v1154_v17 = vrot.slane %v1127_v14, %v3310_v53  ;;  %v1161_v22 = vrot.slane %v2653_v16, %v3310_v53 }
 0x42a   : > { %v1595_v19 = vsel %vm1534_vm4, %v2993_v15, 0.0  ;;  %v1611_v25 = vpack.c.bf16 %v2993_v15, %v2993_v15 }
 0x42b   : > { %v2995_v20 = vpop.eup %2994  ;;  %1596 = vadd.xlane.f32.xlu1 %v1595_v19  ;;  %v1803_v18 = vsel %vm1534_vm4, %v1154_v17, 0  ;;  %v1162_v28 = vcombine.high %v1154_v17, %v1154_v17  ;;  %v1163_v27 = vcombine.high %v1161_v22, %v1161_v22  ;;  %v1895_v29 = vsel %vm1534_vm4, %v1161_v22, 0 }
 0x42c   : > { %2847 = vmatpush3.bf16.xpose.msra.mxu1 %v1803_v18  ;;  %v1598_v21 = vsel %vm1534_vm4, %v2995_v20, 0.0  ;;  %v1612_v30 = vpack.c.bf16 %v2995_v20, %v2995_v20 }
 0x42d   : > { %1599 = vadd.xlane.f32.xlu0 %v1598_v21  ;;  %v1849_v23 = vsel %vm1534_vm4, %v1162_v28, 0  ;;  %2858 = vmatprep.subr.bf16.mxu1 %v3087_v33  ;;  %v1941_v31 = vsel %vm1534_vm4, %v1163_v27, 0 }
 0x42e   : > { %2853 = vmatpush3.bf16.xpose.msra.mxu0 %v1849_v23 }
 0x42f   : > { %2864 = vmatprep.subr.bf16.mxu0 %v3087_v33 }
 0x433   : > { %2849 = vmatmul.mubr.msk.bf16.vlgmr.msra.gmra.mrb[24].mxu1 %vm1534_vm4, %v1611_v25 }
 0x434   : > { %2859 = vmatpush3.bf16.xpose.msra.mxu1 %v1895_v29  ;;  %2860 = vmatprep.mubr.msk.bf16.mxu1 %vm3088_vm1, %v3087_v33 }
 0x435   : > { %2855 = vmatmul.mubr.msk.bf16.vlgmr.msra.gmra.mrb[36].mxu0 %vm1534_vm4, %v1612_v30  ;;  %2870 = vmatprep.subr.bf16.mxu1 %v3087_v33 }
 0x436   : > { %2865 = vmatpush3.bf16.xpose.msra.mxu0 %v1941_v31  ;;  %2866 = vmatprep.mubr.msk.bf16.mxu0 %vm3088_vm1, %v3087_v33  ;;  %v2968_v31 = vld [vmem:[%s3595_s9] sm:$0xff]  }
 0x437   : > { %2878 = vmatprep.subr.bf16.mxu0 %v3087_v33 }
 0x44f   : > { %v1555_v32 = vpop.xlane.xlu1 %1554 }
 0x450   : > { %v1565_v34 = vsub.f32 %v3387_v24, %v1555_v32 }
 0x451   : > { %v1558_v35 = vpop.xlane.xlu0 %1557 }
 0x452   : > { %v1579_v36 = vmul.f32 1.442695, %v1565_v34  ;;  %v1566_v37 = vsub.f32 %v3389_v26, %v1558_v35  ;;  %v2969_v34 = vld [vmem:[%s3595_s9 + $0x8] sm:$0xff]  }
 0x454   : > { %2996 = vpow2.f32 %v1579_v36  ;;  %v1581_v38 = vmul.f32 1.442695, %v1566_v37 }
 0x456   : > { %2998 = vpow2.f32 %v1581_v38 }
 0x45e   : > { %v2997_v39 = vpop.eup %2996 }
 0x45f   : > { %v1601_v40 = vsel %vm1534_vm4, %v2997_v39, 0.0  ;;  %v1613_v41 = vpack.c.bf16 %v2997_v39, %v2997_v39 }
 0x460   : > { %v2999_v42 = vpop.eup %2998  ;;  %1602 = vadd.xlane.f32.xlu1 %v1601_v40 }
 0x461   : > { %2861 = vmatmul.mubr.msk.bf16.vlgmr.msra.gmra.mrb[28].mxu1 %vm1534_vm4, %v1613_v41  ;;  %v1604_v43 = vsel %vm1534_vm4, %v2999_v42, 0.0  ;;  %v1614_v44 = vpack.c.bf16 %v2999_v42, %v2999_v42 }
 0x462   : > { %1605 = vadd.xlane.f32.xlu0 %v1604_v43  ;;  %2874 = vmatprep.mubr.msk.bf16.mxu1 %vm3088_vm1, %v3087_v33 }
 0x463   : > { %2867 = vmatmul.mubr.msk.bf16.vlgmr.msra.gmra.mrb[40].mxu0 %vm1534_vm4, %v1614_v44  ;;  %2871 = vmatpush3.bf16.msra.mxu1 %v2968_v31  ;;  %v2975_v31 = vld [vmem:[%s3601_s15 + $0x18] sm:$0xff]  }
 0x464   : > { %2882 = vmatprep.mubr.msk.bf16.mxu0 %vm3088_vm1, %v3087_v33  ;;  %2872 = vmatprep.subr.bf16.mxu1 %v3087_v33 }
 0x467   : > { %2873 = vmatpush3.bf16.msra.mxu1 %v2969_v34  ;;  %v2977_v34 = vld [vmem:[%s3601_s15 + $0x28] sm:$0xff]  }
 0x468   : > { %2886 = vmatprep.subr.bf16.mxu1 %v3087_v33 }
 0x4a8   : > { %v1585_v24 = vpop.xlane.xlu1 %1584 }
 0x4a9   : > { %3000 = vrcp.f32 %v1585_v24 }
 0x4aa   : > { %v1588_v26 = vpop.xlane.xlu0 %1587 }
 0x4ab   : > { %3002 = vrcp.f32 %v1588_v26 }
 0x4b0   : > { %v1591_v45 = vpop.xlane.xlu1 %1590 }
 0x4b1   : > { %3004 = vrcp.f32 %v1591_v45 }
 0x4b2   : > { %v1594_v46 = vpop.xlane.xlu0 %1593 }
 0x4b3   : > { %v3001_v47 = vpop.eup %3000  ;;  %3006 = vrcp.f32 %v1594_v46 }
 0x4b5   : > { %v3003_v52 = vpop.eup %3002 }
 0x4b8   : > { %v1597_v0 = vpop.xlane.xlu1 %1596 }
 0x4b9   : > { %3008 = vrcp.f32 %v1597_v0 }
 0x4ba   : > { %v1600_v10 = vpop.xlane.xlu0 %1599 }
 0x4bb   : > { %v3005_v62 = vpop.eup %3004  ;;  %3010 = vrcp.f32 %v1600_v10 }
 0x4bd   : > { %v3007_v3 = vpop.eup %3006 }
 0x4c3   : > { %v3009_v14 = vpop.eup %3008 }
 0x4c5   : > { %v3011_v19 = vpop.eup %3010 }
 0x4ed   : > { %v1603_v30 = vpop.xlane.xlu1 %1602 }
 0x4ee   : > { %3012 = vrcp.f32 %v1603_v30  ;;  %v2974_v30 = vld [vmem:[%s3601_s15 + $0x10] sm:$0xff]  }
 0x4ef   : > { %v1655_v48 = vpop.f32.mrb[16].mxu1  ;;  %v1606_v32 = vpop.xlane.xlu0 %1605 }
 0x4f0   : > { %v1991_v50 = vmul.f32 %v3001_v47, %v1655_v48  ;;  %v2826_v51 = vpop.f32.mrb[17].mxu1  ;;  %3014 = vrcp.f32 %v1606_v32  ;;  %v2976_v32 = vld [vmem:[%s3601_s15 + $0x20] sm:$0xff]  }
 0x4f1   : > { %v1658_v54 = vpop.f32.mrb[18].mxu1  ;;  %v1701_v55 = vpop.f32.mrb[28].mxu0 }
 0x4f2   : > { %v1999_v56 = vpack.c.bf16 %v1991_v50, %v1991_v50  ;;  %v1992_v57 = vmul.f32 %v3003_v52, %v1701_v55  ;;  %v2827_v58 = vpop.f32.mrb[19].mxu1  ;;  %v2832_v59 = vpop.f32.mrb[29].mxu0 }
 0x4f3   : > { %v1704_v60 = vpop.f32.mrb[30].mxu0 }
 0x4f4   : > { %v2000_v49 = vpack.c.bf16 %v1992_v57, %v1992_v57  ;;  %2007 = vxpose.xlu1.c.b16.start.end [1/1] (short) (narrow) %v1999_v56, 16  ;;  %v2833_v61 = vpop.f32.mrb[31].mxu0 }
 0x4f6   : > { %2023 = vxpose.xlu0.c.b16.start.end [1/1] (short) (narrow) %v2000_v49, 16 }
 0x4f7   : > { %v1747_v63 = vpop.f32.mrb[20].mxu1 }
 0x4f8   : > { %v1993_v1 = vmul.f32 %v3005_v62, %v1747_v63  ;;  %v2838_v2 = vpop.f32.mrb[21].mxu1  ;;  %v3013_v35 = vpop.eup %3012 }
 0x4f9   : > { %v1750_v4 = vpop.f32.mrb[22].mxu1  ;;  %v1793_v5 = vpop.f32.mrb[32].mxu0 }
 0x4fa   : > { %v2001_v6 = vpack.c.bf16 %v1993_v1, %v1993_v1  ;;  %v1994_v7 = vmul.f32 %v3007_v3, %v1793_v5  ;;  %v2839_v8 = vpop.f32.mrb[23].mxu1  ;;  %v2844_v9 = vpop.f32.mrb[33].mxu0  ;;  %v2670_v3 = vld [vmem:[%s3596_s10] ss:$0 sm:$0xff] }
 0x4fb   : > { %v1796_v11 = vpop.f32.mrb[34].mxu0  ;;  %v3015_v39 = vpop.eup %3014 }
 0x4fc   : > { %v2002_v12 = vpack.c.bf16 %v1994_v7, %v1994_v7  ;;  %2039 = vxpose.xlu1.c.b16.start.end [1/1] (short) (narrow) %v2001_v6, 16  ;;  %v2845_v13 = vpop.f32.mrb[35].mxu0 }
 0x4fe   : > { %2055 = vxpose.xlu0.c.b16.start.end [1/1] (short) (narrow) %v2002_v12, 16 }
 0x506   : > { %v1839_v15 = vpop.f32.mrb[24].mxu1 }
 0x507   : > { %v1995_v16 = vmul.f32 %v3009_v14, %v1839_v15  ;;  %v2850_v17 = vpop.f32.mrb[25].mxu1  ;;  %v2970_v14 = vld [vmem:[%s3599_s13] sm:$0xff]   ;;  %v2971_v15 = vld [vmem:[%s3599_s13 + $0x8] sm:$0xff]  }
 0x508   : > { %v1842_v20 = vpop.f32.mrb[26].mxu1  ;;  %v1885_v18 = vpop.f32.mrb[36].mxu0  ;;  %2879 = vmatpush3.bf16.msra.mxu0 %v2970_v14 }
 0x509   : > { %v2003_v28 = vpack.c.bf16 %v1995_v16, %v1995_v16  ;;  %v1996_v21 = vmul.f32 %v3011_v19, %v1885_v18  ;;  %v2851_v22 = vpop.f32.mrb[27].mxu1  ;;  %v2856_v23 = vpop.f32.mrb[37].mxu0  ;;  %2880 = vmatprep.subr.bf16.mxu0 %v3087_v33  ;;  %v2972_v16 = vld [vmem:[%s3601_s15] sm:$0xff]  }
 0x50a   : > { %v1888_v25 = vpop.f32.mrb[38].mxu0  ;;  %v2675_v22 = vld [vmem:[%s3598_s12] ss:$0 sm:$0xff] }
 0x50b   : > { %v2004_v27 = vpack.c.bf16 %v1996_v21, %v1996_v21  ;;  %2071 = vxpose.xlu1.c.b16.start.end [1/1] (short) (narrow) %v2003_v28, 16  ;;  %v2857_v29 = vpop.f32.mrb[39].mxu0  ;;  %v2674_v28 = vld [vmem:[%s3597_s11] ss:$0 sm:$0xff] }
 0x50c   : > { %2881 = vmatpush3.bf16.msra.mxu0 %v2971_v15  ;;  %v2973_v29 = vld [vmem:[%s3601_s15 + $0x8] sm:$0xff]  }
 0x50d   : > { %2087 = vxpose.xlu0.c.b16.start.end [1/1] (short) (narrow) %v2004_v27, 16  ;;  %2906 = vmatprep.subr.bf16.mxu0 %v3087_v33 }
 0x534   : > { %v1931_v36 = vpop.f32.mrb[28].mxu1 }
 0x535   : > { %v1997_v37 = vmul.f32 %v3013_v35, %v1931_v36  ;;  %v2862_v38 = vpop.f32.mrb[29].mxu1  ;;  %v2978_v35 = vld [vmem:[%s3601_s15 + $0x30] sm:$0xff]   ;;  %v2979_v36 = vld [vmem:[%s3601_s15 + $0x38] sm:$0xff]  }
 0x536   : > { %v1934_v40 = vpop.f32.mrb[30].mxu1  ;;  %v1977_v41 = vpop.f32.mrb[40].mxu0 }
 0x537   : > { %v2005_v42 = vpack.c.bf16 %v1997_v37, %v1997_v37  ;;  %v1998_v43 = vmul.f32 %v3015_v39, %v1977_v41  ;;  %v2863_v44 = vpop.f32.mrb[31].mxu1  ;;  %v2868_v24 = vpop.f32.mrb[41].mxu0  ;;  %v2676_v37 = vld [vmem:[%s3600_s14] ss:$0 sm:$0xff] }
 0x538   : > { %v1980_v26 = vpop.f32.mrb[42].mxu0 }
 0x539   : > { %v2006_v45 = vpack.c.bf16 %v1998_v43, %v1998_v43  ;;  %2103 = vxpose.xlu1.c.b16.start.end [1/1] (short) (narrow) %v2005_v42, 16  ;;  %v2869_v46 = vpop.f32.mrb[43].mxu0 }
 0x53b   : > { %2119 = vxpose.xlu0.c.b16.start.end [1/1] (short) (narrow) %v2006_v45, 16 }
 0x55a   : > { %v2015_v47 = vpop.trf.xlu1 }
 0x55c   : > { %v2031_v48 = vpop.trf.xlu0 }
 0x55d   : > { %v2143_v50 = vcombine.low %v2015_v47, %v2031_v48 }
 0x55f   : > { %v2151_v54 = vrot.slane %v2143_v50, %v3310_v53 }
 0x562   : > { %v2047_v51 = vpop.trf.xlu1 }
 0x564   : > { %v2063_v52 = vpop.trf.xlu0 }
 0x565   : > { %v2144_v55 = vcombine.low %v2047_v51, %v2063_v52  ;;  %v2980_v52 = vld [vmem:[%s3603_s17] sm:$0xff]  }
 0x567   : > { %v2158_v56 = vrot.slane %v2144_v55, %v3310_v53  ;;  %v2680_v55 = vld [vmem:[%s3602_s16] ss:$0 sm:$0xff] }
 0x569   : > { %v2159_v57 = vcombine.low %v2151_v54, %v2158_v56  ;;  %v2981_v54 = vld [vmem:[%s3603_s17 + $0x8] sm:$0xff]  }
 0x56b   : > { %2179 = vxpose.xlu1.c.b16.start [1/2] (short) (narrow) %v2159_v57, 16 }
 0x571   : > { %v2079_v58 = vpop.trf.xlu1 }
 0x573   : > { %v2095_v59 = vpop.trf.xlu0 }
 0x574   : > { %v2160_v49 = vcombine.low %v2079_v58, %v2095_v59 }
 0x576   : > { %v2168_v63 = vrot.slane %v2160_v49, %v3310_v53 }
 0x59f   : > { %v2111_v60 = vpop.trf.xlu1 }
 0x5a1   : > { %v2127_v61 = vpop.trf.xlu0 }
 0x5a2   : > { %v2161_v62 = vcombine.low %v2111_v60, %v2127_v61 }
 0x5a4   : > { %v2175_v0 = vrot.slane %v2161_v62, %v3310_v53 }
 0x5a6   : > { %v2176_v1 = vcombine.low %v2168_v63, %v2175_v0 }
 0x5a8   : > { %2180 = vxpose.xlu1.c.b16.end [2/2] (short) (narrow) %v2176_v1, 16 }
 0x60a   : > { %v2187_v2 = vpop.trf.xlu1 }
 0x60b   : > { %2875 = vmatmul.mubr.msk.bf16.vlgmr.msra.gmra.mrb[32].mxu1 %vm602_vm0, %v2187_v2 }
 0x60c   : > { %2902 = vmatprep.mubr.msk.bf16.mxu1 %vm3088_vm1, %v3087_v33  ;;  %2887 = vmatpush3.bf16.msra.mxu1 %v2972_v16 }
 0x60d   : > { %2888 = vmatprep.subr.bf16.mxu1 %v3087_v33 }
 0x610   : > { %2889 = vmatpush3.bf16.msra.mxu1 %v2973_v29 }
 0x611   : > { %2890 = vmatprep.subr.bf16.mxu1 %v3087_v33 }
 0x614   : > { %2891 = vmatpush3.bf16.msra.mxu1 %v2974_v30 }
 0x615   : > { %2892 = vmatprep.subr.bf16.mxu1 %v3087_v33 }
 0x618   : > { %2893 = vmatpush3.bf16.msra.mxu1 %v2975_v31 }
 0x619   : > { %2894 = vmatprep.subr.bf16.mxu1 %v3087_v33 }
 0x61c   : > { %2895 = vmatpush3.bf16.msra.mxu1 %v2976_v32 }
 0x61d   : > { %2896 = vmatprep.subr.bf16.mxu1 %v3087_v33 }
 0x620   : > { %2897 = vmatpush3.bf16.msra.mxu1 %v2977_v34 }
 0x621   : > { %2898 = vmatprep.subr.bf16.mxu1 %v3087_v33 }
 0x624   : > { %2899 = vmatpush3.bf16.msra.mxu1 %v2978_v35 }
 0x625   : > { %2900 = vmatprep.subr.bf16.mxu1 %v3087_v33 }
 0x628   : > { %2901 = vmatpush3.bf16.msra.mxu1 %v2979_v36 }
 0x6de   : > { %v2255_v4 = vpop.f32.mrb[32].mxu1 }
 0x6df   : > { %v2256_v5 = vadd.f32 %v2670_v3, %v2255_v4  ;;  %v2876_v6 = vpop.f32.mrb[33].mxu1 }
 0x6e0   : > { %v2258_v7 = vpop.f32.mrb[34].mxu1 }
 0x6e1   : > { %v2877_v8 = vpop.f32.mrb[35].mxu1  ;;  %v2263_v9 = vsel %vm602_vm0, %v2256_v5, 0.0 }
 0x6e2   : > { %2264 = vadd.xlane.f32.xlu0 %v2263_v9 }
 0x76f   : > { %v2265_v53 = vpop.xlane.xlu0 %2264 }
 0x770   : > { %v2266_v10 = vmul.f32 0.03125, %v2265_v53 }
 0x772   : > { %v2267_v11 = vsub.f32 %v2256_v5, %v2266_v10  ;;  %v2689_v5 = vld [vmem:[%s3604_s18] ss:$0 sm:$0xff] }
 0x774   : > { %v2268_v12 = vmul.f32 %v2267_v11, %v2267_v11 }
 0x776   : > { %v2269_v13 = vsel %vm602_vm0, %v2268_v12, 0.0 }
 0x777   : > { %2270 = vadd.xlane.f32.xlu1 %v2269_v13 }
 0x804   : > { %v2271_v17 = vpop.xlane.xlu1 %2270 }
 0x805   : > { %v2272_v19 = vmul.f32 0.03125, %v2271_v17 }
 0x807   : > { %v2273_v20 = vadd.f32 1e-05, %v2272_v19 }
 0x809   : > { %3016 = vrsqrt.f32 %v2273_v20 }
 0x813   : > { %v3017_v18 = vpop.eup %3016 }
 0x814   : > { %v2275_v21 = vmul.f32 %v3017_v18, %v2267_v11 }
 0x816   : > { %v2282_v23 = vmul.f32 %v2674_v28, %v2275_v21 }
 0x818   : > { %v2289_v25 = vadd.f32 %v2675_v22, %v2282_v23 }
 0x81a   : > { %v2290_v27 = vpack.c.bf16 %v2289_v25, %v2289_v25 }
 0x81c   : > { %2883 = vmatmul.mubr.msk.bf16.vlgmr.msra.gmra.mrb[44].mxu0 %vm602_vm0, %v2290_v27 }
 0x81d   : > { %2910 = vmatprep.mubr.msk.bf16.mxu0 %vm3088_vm1, %v3087_v33  ;;  %2907 = vmatpush3.bf16.msra.mxu0 %v2980_v52 }
 0x81e   : > { %2908 = vmatprep.subr.bf16.mxu0 %v3087_v33 }
 0x821   : > { %2909 = vmatpush3.bf16.msra.mxu0 %v2981_v54 }
 0x8ef   : > { %v2351_v38 = vpop.f32.mrb[44].mxu0 }
 0x8f0   : > { %v2352_v39 = vadd.f32 %v2676_v37, %v2351_v38  ;;  %v2884_v40 = vpop.f32.mrb[45].mxu0 }
 0x8f1   : > { %v2354_v41 = vpop.f32.mrb[46].mxu0 }
 0x8f2   : > { %v2358_v42 = vmul.f32 %v2352_v39, %v2352_v39  ;;  %v2885_v43 = vpop.f32.mrb[47].mxu0  ;;  %v2357_v47 = vmul.f32 0.5, %v2352_v39 }
 0x8f4   : > { %v2359_v44 = vmul.f32 %v2358_v42, %v2352_v39 }
 0x8f6   : > { %v2360_v24 = vmul.f32 0.044715, %v2359_v44 }
 0x8f8   : > { %v2361_v26 = vadd.f32 %v2360_v24, %v2352_v39 }
 0x8fa   : > { %v2362_v45 = vmul.f32 0.7978846, %v2361_v26 }
 0x8fc   : > { %3018 = vtanh.f32 %v2362_v45 }
 0x906   : > { %v3019_v46 = vpop.eup %3018 }
 0x907   : > { %v2364_v48 = vadd.f32 1.0, %v3019_v46 }
 0x909   : > { %v2365_v50 = vmul.f32 %v2364_v48, %v2357_v47 }
 0x90b   : > { %v2366_v51 = vpack.c.bf16 %v2365_v50, %v2365_v50 }
 0x90d   : > { %2903 = vmatmul.mubr.bf16.vlgmr.msra.gmra.mrb[36].mxu1 %v2366_v51 }
 0x9e0   : > { %v2472_v56 = vpop.f32.mrb[36].mxu1 }
 0x9e1   : > { %v2473_v57 = vadd.f32 %v2680_v55, %v2472_v56  ;;  %v2904_v58 = vpop.f32.mrb[37].mxu1 }
 0x9e2   : > { %v2475_v59 = vpop.f32.mrb[38].mxu1 }
 0x9e3   : > { %v2479_v60 = vmul.f32 %v2473_v57, %v2473_v57  ;;  %v2905_v49 = vpop.f32.mrb[39].mxu1  ;;  %v2478_v1 = vmul.f32 0.5, %v2473_v57 }
 0x9e5   : > { %v2480_v61 = vmul.f32 %v2479_v60, %v2473_v57 }
 0x9e7   : > { %v2481_v62 = vmul.f32 0.044715, %v2480_v61 }
 0x9e9   : > { %v2482_v33 = vadd.f32 %v2481_v62, %v2473_v57 }
 0x9eb   : > { %v2483_v63 = vmul.f32 0.7978846, %v2482_v33 }
 0x9ed   : > { %3020 = vtanh.f32 %v2483_v63 }
 0x9f7   : > { %v3021_v0 = vpop.eup %3020 }
 0x9f8   : > { %v2485_v2 = vadd.f32 1.0, %v3021_v0 }
 0x9fa   : > { %v2486_v3 = vmul.f32 %v2485_v2, %v2478_v1 }
 0x9fc   : > { %v2487_v4 = vpack.c.bf16 %v2486_v3, %v2486_v3 }
 0x9fe   : > { %2911 = vmatmul.mubr.msk.bf16.vlgmr.msra.gmra.mrb[48].mxu0 %vm602_vm0, %v2487_v4 }
 0xad1   : > { %v2548_v6 = vpop.f32.mrb[48].mxu0 }
 0xad2   : > { %v2549_v7 = vadd.f32 %v2689_v5, %v2548_v6  ;;  %v2912_v8 = vpop.f32.mrb[49].mxu0 }
 0xad3   : > { %v2551_v9 = vpop.f32.mrb[50].mxu0 }
 0xad4   : > { %2554 = vst [vmem:[%s593_s22] sm:$0xff] %v2549_v7  ;;  %v2913_v53 = vpop.f32.mrb[51].mxu0 }
 0xad5   : > { %3035 = shalt.err (!%p3032_p3)
}
 0xad6   : > { %s3036_s0 = scalar_lea.hbm %s3544_s25, 128  ;;  %s3040_s20 = scalar_lea.hbm %s3605_s19, 256 }
 0xad7   : > { %p3037_p4 = scmp.ne.s32.totalorder %s3544_s25, %s3036_s0  ;;  %p3041_p9 = scmp.lt.u32.totalorder %s3544_s25, %s3605_s19 }
 0xad8   : > { %p3042_p10 = scmp.lt.u32.totalorder %s3040_s20, %s3036_s0  ;;  %p3044_p12 = scmp.lt.u32.totalorder %s3036_s0, %s3544_s25 }
 0xad9   : > { %p3038_p7 = pnand %p3037_p4, %p3229_p5 }
 0xada   : > { %p3043_p11 = por %p3042_p10, %p3041_p9 }
 0xadb   : > { %p3039_p8 = pneg %p3038_p7 }
 0xadc   : > { %p3045_p13 = por %p3044_p12, %p3043_p11 }
 0xade   : > { %p3046_p0 = pnand %p3045_p13, %p3039_p8 }
 0xae0   : > { %3049 = shalt.err (!%p3046_p0)
}
 0xae1   : > { %2917 = dma.vmem_to_hbm [thread:$0]  (%p3229_p5), %s3546_s23, 128, %s3544_s25, %s2556_s27  }
 0xae2 PF: > { %s3627_s1 = sld [smem:[#allocation5_spill]]  ;;  %p2923_p1 = scmp.ge.s32.totalorder %s3084_s21, 2 }
 0xae4   : > { %p2920_p2 = pnand %p2923_p1, %p3233_p6 }
 0xae8   : > { %s2581_s28 = sand.u32 1, %s3627_s1  }
 0xae9   : > { %s2582_s22 = scalar_lea.sflag [#allocation3], %s2581_s28 }
 0xaea   : > { %3067 = dma.done.wait (!%p2920_p2), %s2582_s22, 128  }
 0xaeb   : > { %3069 = vsyncadd (!%p2920_p2), %s2582_s22, 4294967168  ;;  %s3629_s21 = sld [smem:[#allocation7_spill]]  ;;  %s3630_s20 = sld [smem:[#allocation6_spill]] }
 0xaec   : > { %s3631_s26 = sld [smem:[#allocation8_spill]]  ;;  %s3632_s0 = smov %s3076_s30 }
 0xaf1   : > { %p29_p3 = scmp.ge.s32.totalorder %s3629_s21, 4   ;;  %s3633_s30 = smov %s3630_s20 }
 0xaf2   : > { %s3634_s20 = smov %s3631_s26 }
 0xaf3   :  { %31 = sbr.rel (!%p29_p3) target bundleno = 8 (0x8), region = 131 }
 0xafa   :  { %2587 = vsyncpa [#allocation3], 1 }
 0xafb   :  { %2589 = vsyncpa [#allocation3 + $0x1], 1 }

</bundles_post_ra>
